<compile_context>
chip_gen: v7x
topology: tpu7x:2x2x1
jax: 0.10.0
libtpu: 0.0.40
codegen_flags: <defaults>
</compile_context>

<pallas_src>
import jax
import jax.numpy as jnp
from jax.experimental import pallas as pl
from jax.experimental.pallas import tpu as pltpu


# Tile caps (all multiples of (8,128)); working set at (512,1024,512) bf16,
# double-buffered + f32 acc is ~7-8 MiB -> fits every generation's VMEM.
TM_MAX = 512
TK_MAX = 1024
TN_MAX = 512

CIN0_PAD = 32  # RGB 3 -> 32 so layer-1 K = 4*32 = 128 (no per-layer K padding)


def _round_up(x, m):
    return (x + m - 1) // m * m


def _pick_tm(m):
    """tm: multiple of 16 (bf16 sublane packing); avoid huge M-pad waste."""
    if m <= TM_MAX:
        return _round_up(m, 16)
    for t in (512, 256, 128):
        if _round_up(m, t) - m <= max(m // 16, 16):
            return t
    return 128


def _largest_div_tile(dim, cap):
    """Largest multiple of 128 <= cap that divides dim (dim is a 128-multiple)."""
    t = (min(cap, dim) // 128) * 128
    while dim % t:
        t -= 128
    return t


# ----------------------------------------------------------------------------
# Pallas kernels: tiled bf16 GEMM, f32 accumulation
# ----------------------------------------------------------------------------
def _gemm_kernel_single_k(a_ref, w_ref, o_ref):
    # Whole K fits one block: no scratch, no init/finalize branches.
    o_ref[...] = jnp.dot(
        a_ref[...], w_ref[...], preferred_element_type=jnp.float32
    ).astype(o_ref.dtype)


def _gemm_kernel_multi_k(a_ref, w_ref, o_ref, acc_ref):
    k = pl.program_id(2)
    p = jnp.dot(a_ref[...], w_ref[...], preferred_element_type=jnp.float32)

    @pl.when(k == 0)
    def _():  # skip the zero-fill: first partial product is written directly
        acc_ref[...] = p

    @pl.when(k > 0)
    def _():
        acc_ref[...] += p

    @pl.when(k == pl.num_programs(2) - 1)
    def _():
        o_ref[...] = acc_ref[...].astype(o_ref.dtype)


def _pallas_gemm(a_p, w_p, *, tm, tn, tk, out_dtype):
    """a_p: (Mp, Kp) bf16, w_p: (Kp, Np) bf16; all dims multiples of tiles."""
    mp, kp = a_p.shape
    kp2, np_ = w_p.shape
    assert kp == kp2, (kp, kp2)
    gm, gn, gk = mp // tm, np_ // tn, kp // tk

    flops = 2 * mp * kp * np_
    # A is streamed once per output-column block, B once per output-row block.
    bytes_accessed = (
        mp * kp * 2 * gn + kp * np_ * 2 * gm
        + mp * np_ * jnp.dtype(out_dtype).itemsize
    )

    if gk == 1:
        kernel, scratch = _gemm_kernel_single_k, ()
    else:
        kernel, scratch = _gemm_kernel_multi_k, (pltpu.VMEM((tm, tn), jnp.float32),)

    return pl.pallas_call(
        kernel,
        out_shape=jax.ShapeDtypeStruct((mp, np_), out_dtype),
        grid_spec=pltpu.PrefetchScalarGridSpec(
            num_scalar_prefetch=0,
            grid=(gm, gn, gk),
            in_specs=[
                # On v5e (mem-bound early layers), pipeline_mode=pl.Buffered(3)
                # on this A spec is a candidate knob (measure before adopting).
                pl.BlockSpec((tm, tk), lambda i, j, k: (i, k)),
                pl.BlockSpec((tk, tn), lambda i, j, k: (k, j)),
            ],
            out_specs=pl.BlockSpec((tm, tn), lambda i, j, k: (i, j)),
            scratch_shapes=scratch,
        ),
        compiler_params=pltpu.CompilerParams(
            dimension_semantics=("parallel", "parallel", "arbitrary"),
            vmem_limit_bytes=64 * 1024 * 1024,
        ),
        cost_estimate=pl.CostEstimate(
            flops=flops, transcendentals=0, bytes_accessed=bytes_accessed
        ),
    )(a_p, w_p)


def gemm(a, w_p, *, out_dtype=jnp.float32):
    """a: (M, K) bf16, w_p: (K, Np) bf16 with K, Np multiples of 128."""
    m, k = a.shape
    kp, np_ = w_p.shape
    assert k == kp, (k, kp)

    tm = _pick_tm(m)
    mp = _round_up(m, tm)
    tk = _largest_div_tile(kp, TK_MAX)
    tn = _largest_div_tile(np_, TN_MAX)
    # v7x megacore: keep >= 2 blocks across the parallel axes when possible.
    if mp // tm == 1 and np_ // tn == 1 and np_ >= 256:
        tn = _largest_div_tile(np_, np_ // 2)

    a = a.astype(jnp.bfloat16)
    a_p = a if mp == m else jnp.pad(a, ((0, mp - m), (0, 0)))
    out = _pallas_gemm(a_p, w_p, tm=tm, tn=tn, tk=tk, out_dtype=out_dtype)
    # Only the padded M rows are dropped; padded channels are kept (lane-dense,
    # numerically inert since the matching weight rows/cols are zero).
    return out[:m] if mp != m else out


# ----------------------------------------------------------------------------
# One-time weight prep (spectral norm + layout + zero-pad + bf16 cast)
# ----------------------------------------------------------------------------
def spectral_normalize(w, u, power_iterations=1, eps=1e-12):
    cout = w.shape[0]
    w_mat = w.reshape(cout, -1)
    v = None
    for _ in range(power_iterations):
        v = w_mat.T @ u
        v = v / (jnp.linalg.norm(v) + eps)
        u = w_mat @ v
        u = u / (jnp.linalg.norm(u) + eps)
    sigma = u @ (w_mat @ v)
    return w / sigma


def _prep_conv_layer(w, b, u, cin_pad):
    """w: (Cout, Cin, 4, 4) OIHW -> W_all: (4*Cin_pad, 4*Cout_pad) bf16.

    K index layout  = (rh, rw, ci)   (matches the space-to-depth channel order)
    N index layout  = (qh, qw, co)   (the four 2x2/stride-2 tap groups)
    """
    w = spectral_normalize(w, u)
    cout, cin = w.shape[0], w.shape[1]
    cout_p = _round_up(cout, 128)
    # (co, ci, kh, kw) -> (co, ci, qh, rh, qw, rw) -> (rh, rw, ci, qh, qw, co)
    wr = w.reshape(cout, cin, 2, 2, 2, 2).transpose(3, 5, 1, 2, 4, 0)
    wm = jnp.zeros((2, 2, cin_pad, 2, 2, cout_p), jnp.float32)
    wm = wm.at[:, :, :cin, :, :, :cout].set(wr)
    wm = wm.reshape(4 * cin_pad, 4 * cout_p).astype(jnp.bfloat16)
    b_p = jnp.zeros((cout_p,), jnp.float32).at[:cout].set(b)
    return {"w": wm, "b": b_p, "cin_pad": cin_pad, "cout_p": cout_p}


def _prep_fc(fc_w, cin_pad):
    """fc_w: (Ncls+1, Cin, k, k), bias=False -> (k*k*Cin_pad, round128(Ncls+1))."""
    ncls1, cin, k = fc_w.shape[0], fc_w.shape[1], fc_w.shape[2]
    np_ = _round_up(ncls1, 128)
    wm = jnp.zeros((k, k, cin_pad, np_), jnp.float32)
    wm = wm.at[:, :, :cin, :ncls1].set(fc_w.transpose(2, 3, 1, 0))
    wm = wm.reshape(k * k * cin_pad, np_).astype(jnp.bfloat16)
    return {"w": wm, "n": ncls1}


def prep_weights(conv_params, fc_w):
    layers = []
    cin_pad = CIN0_PAD
    for p in conv_params:
        layer = _prep_conv_layer(p["w"], p["b"], p["u"], cin_pad)
        layers.append(layer)
        cin_pad = layer["cout_p"]
    return layers, _prep_fc(fc_w, cin_pad)


# ----------------------------------------------------------------------------
# Conv(4x4, s=2, p=1) + bias + LeakyReLU, NHWC, via space-to-depth GEMM
# ----------------------------------------------------------------------------
def conv4s2p1_layer(h, layer):
    """h: (N, H, W, Cin_pad) bf16 -> (N, H/2, W/2, Cout_pad) bf16."""
    n, hh, ww, c = h.shape
    ho, wo = hh // 2, ww // 2

    # pad + space-to-depth(2): y[n,a,b,(rh,rw,c)] = h_pad[n, 2a+rh, 2b+rw, c]
    hp = jnp.pad(h, ((0, 0), (1, 1), (1, 1), (0, 0)))
    y = hp.reshape(n, ho + 1, 2, wo + 1, 2, c).transpose(0, 1, 3, 2, 4, 5)
    y = y.reshape(n * (ho + 1) * (wo + 1), 4 * c)

    # One lane-dense GEMM covering all 16 conv taps (4 groups x 4 sub-taps).
    z = gemm(y, layer["w"], out_dtype=jnp.float32)
    z = z.reshape(n, ho + 1, wo + 1, 4, layer["cout_p"])

    # out[i,j] = sum_{qh,qw} Z_{(qh,qw)}[i+qh, j+qw]  (fused XLA elementwise)
    pre = (z[:, :ho, :wo, 0] + z[:, :ho, 1:, 1]
           + z[:, 1:, :wo, 2] + z[:, 1:, 1:, 3])
    pre = pre + layer["b"]
    out = jnp.where(pre >= 0, pre, jnp.float32(0.01) * pre)  # LeakyReLU(0.01)
    return out.astype(jnp.bfloat16)


# ----------------------------------------------------------------------------
# Discriminator: parameter init + forward
# ----------------------------------------------------------------------------
def init_params(key, num_classes, image_size, conv_dim, repeat_num):
    params = []
    curr_in, curr_out = 3, conv_dim
    for _ in range(repeat_num):
        key, kw_, kb_, ku_ = jax.random.split(key, 4)
        w = jax.random.normal(kw_, (curr_out, curr_in, 4, 4), jnp.float32) * 0.05
        b = jax.random.normal(kb_, (curr_out,), jnp.float32) * 0.05
        u = jax.random.normal(ku_, (curr_out,), jnp.float32)
        params.append({"w": w, "b": b, "u": u})
        curr_in, curr_out = curr_out, curr_out * 2
    k = image_size // (2 ** repeat_num)
    key, kfc = jax.random.split(key)
    fc_w = jax.random.normal(kfc, (num_classes + 1, curr_in, k, k), jnp.float32) * 0.05
    return params, fc_w


def discriminator_forward(x_nchw, conv_layers, fc):
    x = jnp.transpose(x_nchw, (0, 2, 3, 1)).astype(jnp.bfloat16)  # one NCHW->NHWC
    pad_c = conv_layers[0]["cin_pad"] - x.shape[-1]
    if pad_c > 0:  # pad RGB once so every layer's K is a 128-multiple
        x = jnp.pad(x, ((0, 0), (0, 0), (0, 0), (0, pad_c)))
    h = x
    for layer in conv_layers:
        h = conv4s2p1_layer(h, layer)
    n = h.shape[0]
    a = h.reshape(n, -1)                               # (kh, kw, c_pad) order
    out = gemm(a, fc["w"], out_dtype=jnp.float32)[:, :fc["n"]]
    return jnp.squeeze(out.reshape(n, fc["n"], 1, 1))  # matches torch .squeeze()


# ----------------------------------------------------------------------------
# Reference (pure JAX, same bf16-input / f32-accumulate chain)
# ----------------------------------------------------------------------------
def reference_forward(x, conv_params, fc_w):
    h = x
    for p in conv_params:
        w_sn = spectral_normalize(p["w"], p["u"])
        dn = jax.lax.conv_dimension_numbers(h.shape, w_sn.shape,
                                            ("NCHW", "OIHW", "NCHW"))
        h = jax.lax.conv_general_dilated(
            h.astype(jnp.bfloat16), w_sn.astype(jnp.bfloat16),
            (2, 2), ((1, 1), (1, 1)),
            dimension_numbers=dn, preferred_element_type=jnp.float32)
        h = h + p["b"].reshape(1, -1, 1, 1)
        h = jnp.where(h >= 0, h, jnp.float32(0.01) * h)
    dn = jax.lax.conv_dimension_numbers(h.shape, fc_w.shape,
                                        ("NCHW", "OIHW", "NCHW"))
    out = jax.lax.conv_general_dilated(
        h.astype(jnp.bfloat16), fc_w.astype(jnp.bfloat16), (1, 1), "VALID",
        dimension_numbers=dn, preferred_element_type=jnp.float32)
    return jnp.squeeze(out)


# ----------------------------------------------------------------------------
if __name__ == "__main__":
    # Small, shape-consistent config: image 16, 3 downsampling convs -> 2x2,
    # fc kernel_size = 16 / 2**3 = 2.
    NUM_CLASSES = 4
    IMAGE_SIZE = 16
    CONV_DIM = 8
    REPEAT_NUM = 3
    BATCH = 2

    key = jax.random.PRNGKey(0)
    key, kx = jax.random.split(key)
    x = jax.random.normal(kx, (BATCH, 3, IMAGE_SIZE, IMAGE_SIZE), jnp.float32)

    conv_params, fc_w = init_params(key, NUM_CLASSES, IMAGE_SIZE, CONV_DIM, REPEAT_NUM)

    # One-time weight prep (spectral norm + layout + pad + bf16), hoisted out
    # of the per-call forward path.
    conv_layers, fc = prep_weights(conv_params, fc_w)

    fwd = jax.jit(lambda xx: discriminator_forward(xx, conv_layers, fc))
    out = jax.block_until_ready(fwd(x))

    ref = jax.block_until_ready(reference_forward(x, conv_params, fc_w))

    assert out.shape == (BATCH, NUM_CLASSES + 1), out.shape
    assert jnp.allclose(out, ref, rtol=2e-2, atol=2e-2), (
        f"max abs diff {jnp.max(jnp.abs(out - ref))}"
    )

    # Exercise the multi-K-block accumulator kernel path (unused at demo
    # shapes, used at production depths) against a plain dot.
    key, ka, kb = jax.random.split(key, 3)
    at = jax.random.normal(ka, (64, 2048), jnp.float32).astype(jnp.bfloat16)
    wt = jax.random.normal(kb, (2048, 256), jnp.float32).astype(jnp.bfloat16)
    got = jax.block_until_ready(jax.jit(gemm)(at, wt))
    want = jnp.dot(at, wt, preferred_element_type=jnp.float32)
    assert jnp.allclose(got, want, rtol=1e-2, atol=1e-2), (
        f"gemm self-test max abs diff {jnp.max(jnp.abs(got - want))}"
    )

    print("KERNEL_OK")
</pallas_src>

<mosaic_0001>
module attributes {stable_mosaic.version = 11 : i64} {
  func.func @_gemm_kernel_single_k(%arg0: i32, %arg1: i32, %arg2: i32, %arg3: memref<176x128xbf16, #tpu.memory_space<vmem>>, %arg4: memref<128x256xbf16, #tpu.memory_space<vmem>>, %arg5: memref<176x256xf32, #tpu.memory_space<vmem>>) attributes {dimension_semantics = [#tpu.dimension_semantics<parallel>, #tpu.dimension_semantics<parallel>, #tpu.dimension_semantics<arbitrary>], iteration_bounds = array<i64: 1, 2, 1>, scalar_prefetch = 0 : i64, scratch_operands = 0 : i64, tpu.core_type = #tpu.core_type<tc>, window_params = [{transform_indices = @transform_0, window_bounds = array<i64: 176, 128>}, {transform_indices = @transform_1, window_bounds = array<i64: 128, 256>}, {transform_indices = @transform_2, window_bounds = array<i64: 176, 256>}]} {
    %c0 = arith.constant 0 : index
    %c0_0 = arith.constant 0 : index
    %0 = vector.load %arg3[%c0, %c0_0] : memref<176x128xbf16, #tpu.memory_space<vmem>>, vector<176x128xbf16>
    %c0_1 = arith.constant 0 : index
    %c0_2 = arith.constant 0 : index
    %1 = vector.load %arg4[%c0_1, %c0_2] : memref<128x256xbf16, #tpu.memory_space<vmem>>, vector<128x256xbf16>
    %cst = arith.constant dense<0.000000e+00> : vector<176x256xf32>
    %2 = tpu.matmul %0, %1, %cst {dimension_numbers = #tpu.dot_dimension_numbers<[1], [0], [0], [1], [0, 0, 1, 1], [], []>} : vector<176x128xbf16>, vector<128x256xbf16>, vector<176x256xf32> -> vector<176x256xf32>
    %c0_3 = arith.constant 0 : index
    %c0_4 = arith.constant 0 : index
    %3 = vector.load %arg5[%c0_3, %c0_4] : memref<176x256xf32, #tpu.memory_space<vmem>>, vector<176x256xf32>
    tpu.vector_store %arg5[%c0_3, %c0_4], %2 {strides = array<i32>} : memref<176x256xf32, #tpu.memory_space<vmem>>, vector<176x256xf32>,
    return
  }
  func.func @transform_0(%arg0: i32, %arg1: i32, %arg2: i32) -> (i32, i32) {
    %c0_i32 = arith.constant 0 : i32
    return %arg0, %arg2 : i32, i32
  }
  func.func @transform_1(%arg0: i32, %arg1: i32, %arg2: i32) -> (i32, i32) {
    %c0_i32 = arith.constant 0 : i32
    return %arg2, %arg1 : i32, i32
  }
  func.func @transform_2(%arg0: i32, %arg1: i32, %arg2: i32) -> (i32, i32) {
    %c0_i32 = arith.constant 0 : i32
    return %arg0, %arg1 : i32, i32
  }
}

module attributes {stable_mosaic.version = 11 : i64} {
  func.func @_gemm_kernel_single_k(%arg0: i32, %arg1: i32, %arg2: i32, %arg3: memref<64x512xbf16, #tpu.memory_space<vmem>>, %arg4: memref<512x256xbf16, #tpu.memory_space<vmem>>, %arg5: memref<64x256xf32, #tpu.memory_space<vmem>>) attributes {dimension_semantics = [#tpu.dimension_semantics<parallel>, #tpu.dimension_semantics<parallel>, #tpu.dimension_semantics<arbitrary>], iteration_bounds = array<i64: 1, 2, 1>, scalar_prefetch = 0 : i64, scratch_operands = 0 : i64, tpu.core_type = #tpu.core_type<tc>, window_params = [{transform_indices = @transform_0, window_bounds = array<i64: 64, 512>}, {transform_indices = @transform_1, window_bounds = array<i64: 512, 256>}, {transform_indices = @transform_2, window_bounds = array<i64: 64, 256>}]} {
    %c0 = arith.constant 0 : index
    %c0_0 = arith.constant 0 : index
    %0 = vector.load %arg3[%c0, %c0_0] : memref<64x512xbf16, #tpu.memory_space<vmem>>, vector<64x512xbf16>
    %c0_1 = arith.constant 0 : index
    %c0_2 = arith.constant 0 : index
    %1 = vector.load %arg4[%c0_1, %c0_2] : memref<512x256xbf16, #tpu.memory_space<vmem>>, vector<512x256xbf16>
    %cst = arith.constant dense<0.000000e+00> : vector<64x256xf32>
    %2 = tpu.matmul %0, %1, %cst {dimension_numbers = #tpu.dot_dimension_numbers<[1], [0], [0], [1], [0, 0, 1, 1], [], []>} : vector<64x512xbf16>, vector<512x256xbf16>, vector<64x256xf32> -> vector<64x256xf32>
    %c0_3 = arith.constant 0 : index
    %c0_4 = arith.constant 0 : index
    %3 = vector.load %arg5[%c0_3, %c0_4] : memref<64x256xf32, #tpu.memory_space<vmem>>, vector<64x256xf32>
    tpu.vector_store %arg5[%c0_3, %c0_4], %2 {strides = array<i32>} : memref<64x256xf32, #tpu.memory_space<vmem>>, vector<64x256xf32>,
    return
  }
  func.func @transform_0(%arg0: i32, %arg1: i32, %arg2: i32) -> (i32, i32) {
    %c0_i32 = arith.constant 0 : i32
    return %arg0, %arg2 : i32, i32
  }
  func.func @transform_1(%arg0: i32, %arg1: i32, %arg2: i32) -> (i32, i32) {
    %c0_i32 = arith.constant 0 : i32
    return %arg2, %arg1 : i32, i32
  }
  func.func @transform_2(%arg0: i32, %arg1: i32, %arg2: i32) -> (i32, i32) {
    %c0_i32 = arith.constant 0 : i32
    return %arg0, %arg1 : i32, i32
  }
}

module attributes {stable_mosaic.version = 11 : i64} {
  func.func @_gemm_kernel_single_k(%arg0: i32, %arg1: i32, %arg2: i32, %arg3: memref<32x512xbf16, #tpu.memory_space<vmem>>, %arg4: memref<512x256xbf16, #tpu.memory_space<vmem>>, %arg5: memref<32x256xf32, #tpu.memory_space<vmem>>) attributes {dimension_semantics = [#tpu.dimension_semantics<parallel>, #tpu.dimension_semantics<parallel>, #tpu.dimension_semantics<arbitrary>], iteration_bounds = array<i64: 1, 2, 1>, scalar_prefetch = 0 : i64, scratch_operands = 0 : i64, tpu.core_type = #tpu.core_type<tc>, window_params = [{transform_indices = @transform_0, window_bounds = array<i64: 32, 512>}, {transform_indices = @transform_1, window_bounds = array<i64: 512, 256>}, {transform_indices = @transform_2, window_bounds = array<i64: 32, 256>}]} {
    %c0 = arith.constant 0 : index
    %c0_0 = arith.constant 0 : index
    %0 = vector.load %arg3[%c0, %c0_0] : memref<32x512xbf16, #tpu.memory_space<vmem>>, vector<32x512xbf16>
    %c0_1 = arith.constant 0 : index
    %c0_2 = arith.constant 0 : index
    %1 = vector.load %arg4[%c0_1, %c0_2] : memref<512x256xbf16, #tpu.memory_space<vmem>>, vector<512x256xbf16>
    %cst = arith.constant dense<0.000000e+00> : vector<32x256xf32>
    %2 = tpu.matmul %0, %1, %cst {dimension_numbers = #tpu.dot_dimension_numbers<[1], [0], [0], [1], [0, 0, 1, 1], [], []>} : vector<32x512xbf16>, vector<512x256xbf16>, vector<32x256xf32> -> vector<32x256xf32>
    %c0_3 = arith.constant 0 : index
    %c0_4 = arith.constant 0 : index
    %3 = vector.load %arg5[%c0_3, %c0_4] : memref<32x256xf32, #tpu.memory_space<vmem>>, vector<32x256xf32>
    tpu.vector_store %arg5[%c0_3, %c0_4], %2 {strides = array<i32>} : memref<32x256xf32, #tpu.memory_space<vmem>>, vector<32x256xf32>,
    return
  }
  func.func @transform_0(%arg0: i32, %arg1: i32, %arg2: i32) -> (i32, i32) {
    %c0_i32 = arith.constant 0 : i32
    return %arg0, %arg2 : i32, i32
  }
  func.func @transform_1(%arg0: i32, %arg1: i32, %arg2: i32) -> (i32, i32) {
    %c0_i32 = arith.constant 0 : i32
    return %arg2, %arg1 : i32, i32
  }
  func.func @transform_2(%arg0: i32, %arg1: i32, %arg2: i32) -> (i32, i32) {
    %c0_i32 = arith.constant 0 : i32
    return %arg0, %arg1 : i32, i32
  }
}

module attributes {stable_mosaic.version = 11 : i64} {
  func.func @_gemm_kernel_single_k(%arg0: i32, %arg1: i32, %arg2: i32, %arg3: memref<16x512xbf16, #tpu.memory_space<vmem>>, %arg4: memref<512x128xbf16, #tpu.memory_space<vmem>>, %arg5: memref<16x128xf32, #tpu.memory_space<vmem>>) attributes {dimension_semantics = [#tpu.dimension_semantics<parallel>, #tpu.dimension_semantics<parallel>, #tpu.dimension_semantics<arbitrary>], iteration_bounds = array<i64: 1, 1, 1>, scalar_prefetch = 0 : i64, scratch_operands = 0 : i64, tpu.core_type = #tpu.core_type<tc>, window_params = [{transform_indices = @transform_0, window_bounds = array<i64: 16, 512>}, {transform_indices = @transform_1, window_bounds = array<i64: 512, 128>}, {transform_indices = @transform_2, window_bounds = array<i64: 16, 128>}]} {
    %c0 = arith.constant 0 : index
    %c0_0 = arith.constant 0 : index
    %0 = vector.load %arg3[%c0, %c0_0] : memref<16x512xbf16, #tpu.memory_space<vmem>>, vector<16x512xbf16>
    %c0_1 = arith.constant 0 : index
    %c0_2 = arith.constant 0 : index
    %1 = vector.load %arg4[%c0_1, %c0_2] : memref<512x128xbf16, #tpu.memory_space<vmem>>, vector<512x128xbf16>
    %cst = arith.constant dense<0.000000e+00> : vector<16x128xf32>
    %2 = tpu.matmul %0, %1, %cst {dimension_numbers = #tpu.dot_dimension_numbers<[1], [0], [0], [1], [0, 0, 1, 1], [], []>} : vector<16x512xbf16>, vector<512x128xbf16>, vector<16x128xf32> -> vector<16x128xf32>
    %c0_3 = arith.constant 0 : index
    %c0_4 = arith.constant 0 : index
    %3 = vector.load %arg5[%c0_3, %c0_4] : memref<16x128xf32, #tpu.memory_space<vmem>>, vector<16x128xf32>
    tpu.vector_store %arg5[%c0_3, %c0_4], %2 {strides = array<i32>} : memref<16x128xf32, #tpu.memory_space<vmem>>, vector<16x128xf32>,
    return
  }
  func.func @transform_0(%arg0: i32, %arg1: i32, %arg2: i32) -> (i32, i32) {
    %c0_i32 = arith.constant 0 : i32
    return %arg0, %arg2 : i32, i32
  }
  func.func @transform_1(%arg0: i32, %arg1: i32, %arg2: i32) -> (i32, i32) {
    %c0_i32 = arith.constant 0 : i32
    return %arg2, %arg1 : i32, i32
  }
  func.func @transform_2(%arg0: i32, %arg1: i32, %arg2: i32) -> (i32, i32) {
    %c0_i32 = arith.constant 0 : i32
    return %arg0, %arg1 : i32, i32
  }
}

</mosaic_0001>

<bundles_post_ra>
// kernel: _lambda_.4
= control target key start
LH: loop header
LB: loop body
LE: loop exit
PB: predicated region body
PF: predicated region fallthrough
CT: control target
= control target key end

     0   :  { %7 = vsyncpa [#allocation3], 0  ;;  %s1362_s0 = inlined_call_operand.hbm [shape: bf16[176,128], index: 0, kind: input, shape index: {}]   ;;  %s1363_s1 = inlined_call_operand.hbm [shape: bf16[128,512], index: 1, kind: input, shape index: {}]   ;;  %s1364_s2 = inlined_call_operand.hbm [shape: f32[176,512], index: 2, kind: output, shape index: {}]  }
   0x1   :  { %8 = vsyncpa [#allocation6], 0 }
   0x2   :  { %10 = vsyncpa [#allocation6 + $0x1], 0 }
   0x3   :  { %11 = vsyncpa [#allocation4], 0 }
   0x4   :  { %13 = vsyncpa [#allocation4 + $0x1], 0  ;;  %s1065_s9 = smov 0   ;;  %s1067_s10 = smov 0  }
   0x5   :  { %s1069_s11 = smov 0   ;;  %s1071_s12 = smov 0  }
   0x6   :  { %s1073_s13 = smov 0   ;;  %s1075_s14 = smov 0  }
   0x7 LB: > { %s714_s15 = sadd.s32 4294967295, %s1036_s14   ;;  %s715_s16 = sadd.s32 4294967294, %s1036_s14   ;;  %s1036_s14 = sphi %s1075_s14, %s19_s14   ;;  %s1032_s13 = sphi %s1073_s13, %s1390_s13   ;;  %s1028_s12 = sphi %s1071_s12, %s1389_s12   ;;  %s1024_s11 = sphi %s1069_s11, %s1388_s11   ;;  %s1020_s10 = sphi %s1067_s10, %s1387_s10   ;;  %s1016_s9 = sphi %s1065_s9, %s1386_s9  }
   0x8   : > { %p82_p0 = scmp.ne.s32.totalorder %s1024_s11, %s1020_s10  ;;  %p83_p1 = scmp.eq.s32.totalorder %s1036_s14, 0 }
   0x9   : > { %p88_p2 = scmp.ne.s32.totalorder %s1020_s10, %s1016_s9  ;;  %p1102_p3 = scmp.eq.s32.totalorder %s714_s15, 0 }
   0xa   : > { %p1106_p4 = por %p83_p1, %p82_p0  ;;  %p114_p5 = scmp.eq.s32.totalorder %s714_s15, 1 }
   0xb   : > { %s1371_s17 = scalar_select %p1102_p3, 1, 0 }
   0xc   : > { %p1112_p6 = por %p1102_p3, %p88_p2  ;;  %p120_p7 = scmp.eq.s32.totalorder %s715_s16, 1 }
   0xd   : > { %p1116_p8 = por %p114_p5, %p82_p0  ;;  %p716_p9 = scmp.ge.s32.totalorder %s1036_s14, 1 }
   0xe   : > { %s1373_s19 = scalar_select %p1112_p6, 1, 0 }
   0xf   : > { %s1374_s20 = scalar_select %p1116_p8, 1, 0 }
  0x10   : > { %p1121_p10 = por %p120_p7, %p88_p2  ;;  %p127_p11 = scmp.lt.s32.totalorder %s1036_s14, 3 }
  0x11   : > { %s1038_s23 = smov [#allocation2]   ;;  %p796_p1 = scmp.lt.s32.totalorder %s1036_s14, 2 }
  0x12   : > { %s1375_s21 = scalar_select %p1121_p10, 1, 0 }
  0x13   : > { %p1126_p12 = pnand %p716_p9, %p127_p11  ;;  %s143_s24 = sshll.u32 %s1038_s23, 4  ;;  %s1130_s24 = int_to_ptr.vmem [resolvable:$true] %s143_s24 }
  0x14   : > { %p1144_p2 = pnand %p796_p1, %p1106_p4  ;;  %s34_s27 = sadd.s32 1, %s1032_s13 }
  0x15   : > { %s1376_s22 = scalar_select %p1126_p12, 1, 0 }
  0x16   : > { %p783_p13 = pneg %p1126_p12  ;;  %s892_s30 = scalar_lea.hbm %s1362_s0, 1408 }
  0x17   : > { %s1378_s26 = scalar_select %p1144_p2, 1, 0 }
  0x18   : > { %p1138_p5 = pnand %p783_p13, %p1102_p3  ;;  %p893_p7 = scmp.ne.s32.totalorder %s1362_s0, %s892_s30 }
  0x19   : > { %p899_p4 = scmp.lt.u32.totalorder %s892_s30, %s1362_s0 }
  0x1a   : > { %p894_p9 = pneg %p1138_p5 }
  0x1c   : > { %p895_p11 = pnand %p894_p9, %p893_p7 }
  0x1e   : > { %p896_p13 = pneg %p895_p11 }
  0x20   : > { %p901_p1 = pnand %p899_p4, %p896_p13 }
  0x22   : > { %904 = shalt.err (!%p901_p1)
}
  0x23   : > { %s905_s7 = scalar_lea.vmem %s1130_s24, 1408  ;;  %p913_p6 = scmp.lt.s32.totalorder %s1130_s24, %s1130_s24 }
  0x24   : > { %p906_p0 = scmp.ne.s32.totalorder %s1130_s24, %s905_s7  ;;  %p914_p3 = scmp.lt.s32.totalorder %s905_s7, %s905_s7 }
  0x26   : > { %p908_p10 = pnand %p906_p0, %p894_p9  ;;  %p915_p12 = por %p914_p3, %p913_p6 }
  0x28   : > { %p909_p8 = pneg %p908_p10 }
  0x2a   : > { %p916_p2 = pnand %p915_p12, %p909_p8 }
  0x2c   : > { %919 = shalt.err (!%p916_p2)
}
  0x2d   : > { %s1039_s8 = smov 64   ;;  %s1040_s15 = smov 4  }
  0x2e   : > { %786 = dma.hbm_to_vmem [thread:$0]  (!%p1138_p5), %s1362_s0, 1408, %s1130_s24, [#allocation3], %s1039_s8, %s1039_s8, %s1040_s15  }
  0x2f   : > { %p36_p10 = scmp.ge.s32.totalorder %s34_s27, 2  ;;  %s75_s23 = sadd.s32 1, %s1024_s11 }
  0x30   : > { %s157_s28 = sand.u32 1, %s1024_s11   ;;  %s756_s3 = sshll.u32 %s1032_s13, 7 }
  0x31   : > { %s1392_s27 = smov (%p36_p10, %s34_s27), 0  ;;  %s719_s29 = sshll.u32 %s157_s28, 7 }
  0x32   : > { %s71_s30 = ssub.s32 %s1032_s13, %s1392_s27  ;;  %s1180_s25 = scalar_lea.hbm %s1363_s1, %s756_s3 }
  0x33   : > { %p73_p3 = scmp.eq.s32.totalorder %s71_s30, 0  ;;  %s161_s24 = scalar_lea.vmem [#allocation5], %s719_s29 }
  0x34   : > { %s171_s6 = sshll.u32 %s161_s24, 4  ;;  %s1187_s8 = scalar_lea.sflag [#allocation6], %s157_s28  ;;  %s1185_s6 = int_to_ptr.vmem [resolvable:$true] %s171_s6 }
  0x35   : > { %s1183_s7 = scalar_select %p73_p3, %s1024_s11, %s75_s23  }
  0x36   : > { %s920_s15 = scalar_lea.hbm %s1180_s25, 2048  ;;  %p1379_p8 = scmp.ne.s32.totalorder %s1378_s26, 0 }
  0x37   : > { %p921_p6 = scmp.ne.s32.totalorder %s1180_s25, %s920_s15  ;;  %s925_s30 = scalar_lea.hbm %s1363_s1, 4096 }
  0x38   : > { %p922_p12 = pneg %p1379_p8  ;;  %p926_p2 = scmp.lt.u32.totalorder %s1180_s25, %s1363_s1 }
  0x39   : > { %p927_p7 = scmp.lt.u32.totalorder %s925_s30, %s920_s15  ;;  %p929_p11 = scmp.lt.u32.totalorder %s920_s15, %s1180_s25 }
  0x3a   : > { %p923_p0 = pnand %p922_p12, %p921_p6 }
  0x3b   : > { %p928_p9 = por %p927_p7, %p926_p2 }
  0x3c   : > { %p924_p5 = pneg %p923_p0 }
  0x3d   : > { %p930_p13 = por %p929_p11, %p928_p9 }
  0x3f   : > { %p931_p4 = pnand %p930_p13, %p924_p5 }
  0x41   : > { %934 = shalt.err (!%p931_p4)
}
  0x42   : > { %s935_s23 = scalar_lea.vmem %s1185_s6, 2048  ;;  %s1041_s28 = smov [#allocation5]  }
  0x43   : > { %p936_p1 = scmp.ne.s32.totalorder %s1185_s6, %s935_s23  ;;  %s940_s4 = sshll.u32 %s1041_s28, 4  ;;  %s941_s4 = int_to_ptr.vmem [resolvable:$false] %s940_s4 }
  0x44   : > { %s942_s5 = scalar_lea.vmem %s941_s4, 4096  ;;  %p943_p6 = scmp.lt.s32.totalorder %s1185_s6, %s941_s4 }
  0x45   : > { %p938_p10 = pnand %p936_p1, %p922_p12  ;;  %p944_p0 = scmp.lt.s32.totalorder %s942_s5, %s935_s23 }
  0x47   : > { %p939_p3 = pneg %p938_p10  ;;  %p945_p2 = por %p944_p0, %p943_p6 }
  0x49   : > { %p946_p7 = pnand %p945_p2, %p939_p3 }
  0x4b   : > { %949 = shalt.err (!%p946_p7)
}
  0x4c   : > { %s1042_s24 = smov 256   ;;  %s1043_s15 = smov 128  }
  0x4d   : > { %s1044_s16 = smov 8   ;;  %p1380_p12 = scmp.ne.s32.totalorder %s1376_s22, 0 }
  0x4e   : > { %790 = dma.hbm_to_vmem [thread:$0]  (!%p1379_p8), %s1180_s25, 2048, %s1185_s6, %s1187_s8, %s1042_s24, %s1043_s15, %s1044_s16  }
  0x4f   : > { %183 = sbr.rel (%p1380_p12) target bundleno = 396 (0x18c), region = 28  ;;  %p1381_p5 = scmp.ne.s32.totalorder (!%p1380_p12), %s1371_s17, 0 }
  0x56   : > { %1003 = dma.done.wait (%p1381_p5), [#allocation3], 1408  }
  0x57   : > { %1005 = vsyncadd (%p1381_p5), [#allocation3], 4294965888  ;;  %s1222_s18 = sand.u32 1, %s1020_s10   ;;  %p1382_p8 = scmp.ne.s32.totalorder %s1373_s19, 0 }
  0x58   : > { %s724_s30 = sshll.u32 %s1222_s18, 7  ;;  %s190_s29 = scalar_lea.sflag [#allocation6], %s1222_s18 }
  0x59   : > { %s1226_s3 = scalar_lea.vmem [#allocation5], %s724_s30 }
  0x5a   : > { %1007 = dma.done.wait (%p1382_p8), %s190_s29, 2048  }
  0x5b   : > { %1009 = vsyncadd (%p1382_p8), %s190_s29, 4294965248  ;;  %v1045_v0 = vmov 0   ;;  %v857_v1 = vld [vmem:[%s1226_s3 + $0x4] ss:$8 sps:$4 sm:$0xff]   ;;  %v859_v2 = vld [vmem:[%s1226_s3] ss:$8 sps:$4 sm:$0xff]  }
  0x5c   : > { %436 = vmatprep.mubr.bf16.mxu0 %v1045_v0  ;;  %496 = vmatprep.mubr.bf16.mxu1 %v1045_v0  ;;  %v860_v3 = vld [vmem:[%s1226_s3 + $0x14] ss:$8 sps:$4 sm:$0xff]   ;;  %v862_v4 = vld [vmem:[%s1226_s3 + $0x10] ss:$8 sps:$4 sm:$0xff]   ;;  %v863_v5 = vld [vmem:[%s1226_s3 + $0x24] ss:$8 sps:$4 sm:$0xff]  }
  0x5d   : > { %404 = vmatprep.subr.bf16.mxu0 %v857_v1  ;;  %758 = vmatprep.subr.bf16.mxu1 %v857_v1  ;;  %v865_v6 = vld [vmem:[%s1226_s3 + $0x20] ss:$8 sps:$4 sm:$0xff]   ;;  %v866_v7 = vld [vmem:[%s1226_s3 + $0x34] ss:$8 sps:$4 sm:$0xff]   ;;  %v868_v8 = vld [vmem:[%s1226_s3 + $0x30] ss:$8 sps:$4 sm:$0xff]  }
  0x5e   : > { %405 = vmatpush1.bf16.msra.mxu0 %v859_v2  ;;  %766 = vmatpush1.bf16.msra.mxu1 %v859_v2  ;;  %v869_v9 = vld [vmem:[%s1226_s3 + $0x44] ss:$8 sps:$4 sm:$0xff]   ;;  %v871_v10 = vld [vmem:[%s1226_s3 + $0x40] ss:$8 sps:$4 sm:$0xff]   ;;  %v872_v11 = vld [vmem:[%s1226_s3 + $0x54] ss:$8 sps:$4 sm:$0xff]  }
  0x5f   : > { %406 = vmatprep.subr.bf16.mxu0 %v860_v3  ;;  %759 = vmatprep.subr.bf16.mxu1 %v860_v3  ;;  %v874_v12 = vld [vmem:[%s1226_s3 + $0x50] ss:$8 sps:$4 sm:$0xff]   ;;  %v875_v13 = vld [vmem:[%s1226_s3 + $0x64] ss:$8 sps:$4 sm:$0xff]   ;;  %v877_v14 = vld [vmem:[%s1226_s3 + $0x60] ss:$8 sps:$4 sm:$0xff]  }
  0x60   : > { %v878_v15 = vld [vmem:[%s1226_s3 + $0x74] ss:$8 sps:$4 sm:$0xff]   ;;  %v880_v16 = vld [vmem:[%s1226_s3 + $0x70] ss:$8 sps:$4 sm:$0xff]   ;;  %v881_v17 = vld [vmem:[#allocation2] sm:$0xff]   ;;  %s774_s17 = smul.u32 352, %s1222_s18 }
  0x61   : > { %v882_v18 = vld [vmem:[#allocation2 + $0x30] sm:$0xff]   ;;  %v883_v19 = vld [vmem:[#allocation2 + $0x8] sm:$0xff]   ;;  %v884_v20 = vld [vmem:[#allocation2 + $0x38] sm:$0xff]   ;;  %s757_s22 = sshll.u32 %s1028_s12, 8  ;;  %s592_s12 = scalar_lea.sflag [#allocation4], %s1222_s18 }
  0x62   : > { %407 = vmatpush1.bf16.msra.mxu0 %v862_v4  ;;  %767 = vmatpush1.bf16.msra.mxu1 %v862_v4  ;;  %v885_v21 = vld [vmem:[#allocation2 + $0x10] sm:$0xff]   ;;  %v886_v22 = vld [vmem:[#allocation2 + $0x40] sm:$0xff]   ;;  %v887_v23 = vld [vmem:[#allocation2 + $0x18] sm:$0xff]   ;;  %s1260_s19 = scalar_lea.vmem [#allocation7], %s774_s17  ;;  %s1307_s8 = scalar_lea.hbm %s1364_s2, %s757_s22 }
  0x63   : > { %408 = vmatprep.subr.bf16.mxu0 %v863_v5  ;;  %760 = vmatprep.subr.bf16.mxu1 %v863_v5  ;;  %v888_v24 = vld [vmem:[#allocation2 + $0x48] sm:$0xff]   ;;  %v889_v25 = vld [vmem:[#allocation2 + $0x20] sm:$0xff]   ;;  %v890_v26 = vld [vmem:[#allocation2 + $0x50] sm:$0xff]   ;;  %s608_s26 = sshll.u32 %s1260_s19, 4  ;;  %p1383_p11 = scmp.ne.s32.totalorder %s1374_s20, 0  ;;  %s1310_s26 = int_to_ptr.vmem [resolvable:$true] %s608_s26 }
  0x64   : > { %v891_v27 = vld [vmem:[#allocation2 + $0x28] sm:$0xff]   ;;  %s950_s23 = scalar_lea.vmem %s1310_s26, 5632  ;;  %s1046_s28 = smov [#allocation7]  }
  0x65   : > { %p951_p9 = scmp.ne.s32.totalorder %s1310_s26, %s950_s23  ;;  %s954_s4 = sshll.u32 %s1046_s28, 4  ;;  %s955_s4 = int_to_ptr.vmem [resolvable:$false] %s954_s4 }
  0x66   : > { %409 = vmatpush1.bf16.msra.mxu0 %v865_v6  ;;  %768 = vmatpush1.bf16.msra.mxu1 %v865_v6  ;;  %s956_s5 = scalar_lea.vmem %s955_s4, 11264  ;;  %p957_p1 = scmp.lt.s32.totalorder %s1310_s26, %s955_s4 }
  0x67   : > { %410 = vmatprep.subr.bf16.mxu0 %v866_v7  ;;  %761 = vmatprep.subr.bf16.mxu1 %v866_v7  ;;  %p952_p13 = pnand %p951_p9, %p1383_p11  ;;  %p958_p10 = scmp.lt.s32.totalorder %s956_s5, %s950_s23 }
  0x69   : > { %p953_p4 = pneg %p952_p13  ;;  %p959_p3 = por %p958_p10, %p957_p1 }
  0x6a   : > { %411 = vmatpush1.bf16.msra.mxu0 %v868_v8  ;;  %769 = vmatpush1.bf16.msra.mxu1 %v868_v8 }
  0x6b   : > { %412 = vmatprep.subr.bf16.mxu0 %v869_v9  ;;  %762 = vmatprep.subr.bf16.mxu1 %v869_v9  ;;  %p960_p6 = pnand %p959_p3, %p953_p4 }
  0x6e   : > { %413 = vmatpush1.bf16.msra.mxu0 %v871_v10  ;;  %770 = vmatpush1.bf16.msra.mxu1 %v871_v10 }
  0x6f   : > { %414 = vmatprep.subr.bf16.mxu0 %v872_v11  ;;  %763 = vmatprep.subr.bf16.mxu1 %v872_v11 }
  0x72   : > { %415 = vmatpush1.bf16.msra.mxu0 %v874_v12  ;;  %771 = vmatpush1.bf16.msra.mxu1 %v874_v12 }
  0x73   : > { %416 = vmatprep.subr.bf16.mxu0 %v875_v13  ;;  %764 = vmatprep.subr.bf16.mxu1 %v875_v13 }
  0x76   : > { %417 = vmatpush1.bf16.msra.mxu0 %v877_v14  ;;  %772 = vmatpush1.bf16.msra.mxu1 %v877_v14 }
  0x77   : > { %418 = vmatprep.subr.bf16.mxu0 %v878_v15  ;;  %765 = vmatprep.subr.bf16.mxu1 %v878_v15 }
  0x7a   : > { %419 = vmatpush1.bf16.msra.mxu0 %v880_v16  ;;  %773 = vmatpush1.bf16.msra.mxu1 %v880_v16 }
  0x7d   : > { %437 = vmatmul.mubr.bf16.vlgmr.msra.gmra.mrb[0].mxu0 %v881_v17  ;;  %497 = vmatmul.mubr.bf16.vlgmr.msra.gmra.mrb[0].mxu1 %v882_v18 }
  0x7e   : > { %446 = vmatprep.mubr.bf16.mxu0 %v1045_v0  ;;  %506 = vmatprep.mubr.bf16.mxu1 %v1045_v0 }
  0x85   : > { %447 = vmatmul.mubr.bf16.gmra.mrb[4].mxu0 %v883_v19  ;;  %507 = vmatmul.mubr.bf16.gmra.mrb[4].mxu1 %v884_v20 }
  0x86   : > { %456 = vmatprep.mubr.bf16.mxu0 %v1045_v0  ;;  %516 = vmatprep.mubr.bf16.mxu1 %v1045_v0 }
  0x8d   : > { %457 = vmatmul.mubr.bf16.gmra.mrb[8].mxu0 %v885_v21  ;;  %517 = vmatmul.mubr.bf16.gmra.mrb[8].mxu1 %v886_v22 }
  0x8e   : > { %466 = vmatprep.mubr.bf16.mxu0 %v1045_v0  ;;  %526 = vmatprep.mubr.bf16.mxu1 %v1045_v0 }
  0x95   : > { %467 = vmatmul.mubr.bf16.gmra.mrb[12].mxu0 %v887_v23  ;;  %527 = vmatmul.mubr.bf16.gmra.mrb[12].mxu1 %v888_v24 }
  0x96   : > { %476 = vmatprep.mubr.bf16.mxu0 %v1045_v0  ;;  %536 = vmatprep.mubr.bf16.mxu1 %v1045_v0 }
  0x9d   : > { %477 = vmatmul.mubr.bf16.gmra.mrb[16].mxu0 %v889_v25  ;;  %537 = vmatmul.mubr.bf16.gmra.mrb[16].mxu1 %v890_v26 }
  0x9e   : > { %486 = vmatprep.mubr.bf16.mxu0 %v1045_v0 }
  0xa5   : > { %487 = vmatmul.mubr.bf16.gmra.mrb[20].mxu0 %v891_v27 }
 0x150   : > { %v438_v28 = vpop.f32.mrb[0].mxu0  ;;  %v498_v29 = vpop.f32.mrb[0].mxu1 }
 0x151   : > { %547 = vst [vmem:[%s1260_s19] sm:$0xff] %v438_v28  ;;  %v440_v30 = vpop.f32.mrb[1].mxu0  ;;  %571 = vst [vmem:[%s1260_s19 + $0xc0] sm:$0xff] %v498_v29  ;;  %v500_v31 = vpop.f32.mrb[1].mxu1 }
 0x152   : > { %548 = vst [vmem:[%s1260_s19 + $0x8] sm:$0xff] %v440_v30  ;;  %v442_v32 = vpop.f32.mrb[2].mxu0  ;;  %572 = vst [vmem:[%s1260_s19 + $0xc8] sm:$0xff] %v500_v31  ;;  %v502_v33 = vpop.f32.mrb[2].mxu1 }
 0x153   : > { %549 = vst [vmem:[%s1260_s19 + $0x10] sm:$0xff] %v442_v32  ;;  %v444_v34 = vpop.f32.mrb[3].mxu0  ;;  %573 = vst [vmem:[%s1260_s19 + $0xd0] sm:$0xff] %v502_v33  ;;  %v504_v35 = vpop.f32.mrb[3].mxu1 }
 0x154   : > { %550 = vst [vmem:[%s1260_s19 + $0x18] sm:$0xff] %v444_v34  ;;  %574 = vst [vmem:[%s1260_s19 + $0xd8] sm:$0xff] %v504_v35 }
 0x158   : > { %v448_v36 = vpop.f32.mrb[4].mxu0  ;;  %v508_v37 = vpop.f32.mrb[4].mxu1 }
 0x159   : > { %551 = vst [vmem:[%s1260_s19 + $0x20] sm:$0xff] %v448_v36  ;;  %v450_v38 = vpop.f32.mrb[5].mxu0  ;;  %575 = vst [vmem:[%s1260_s19 + $0xe0] sm:$0xff] %v508_v37  ;;  %v510_v39 = vpop.f32.mrb[5].mxu1 }
 0x15a   : > { %552 = vst [vmem:[%s1260_s19 + $0x28] sm:$0xff] %v450_v38  ;;  %v452_v40 = vpop.f32.mrb[6].mxu0  ;;  %576 = vst [vmem:[%s1260_s19 + $0xe8] sm:$0xff] %v510_v39  ;;  %v512_v41 = vpop.f32.mrb[6].mxu1 }
 0x15b   : > { %553 = vst [vmem:[%s1260_s19 + $0x30] sm:$0xff] %v452_v40  ;;  %v454_v42 = vpop.f32.mrb[7].mxu0  ;;  %577 = vst [vmem:[%s1260_s19 + $0xf0] sm:$0xff] %v512_v41  ;;  %v514_v43 = vpop.f32.mrb[7].mxu1 }
 0x15c   : > { %554 = vst [vmem:[%s1260_s19 + $0x38] sm:$0xff] %v454_v42  ;;  %578 = vst [vmem:[%s1260_s19 + $0xf8] sm:$0xff] %v514_v43 }
 0x160   : > { %v458_v44 = vpop.f32.mrb[8].mxu0  ;;  %v518_v45 = vpop.f32.mrb[8].mxu1 }
 0x161   : > { %555 = vst [vmem:[%s1260_s19 + $0x40] sm:$0xff] %v458_v44  ;;  %v460_v46 = vpop.f32.mrb[9].mxu0  ;;  %579 = vst [vmem:[%s1260_s19 + $0x100] sm:$0xff] %v518_v45  ;;  %v520_v47 = vpop.f32.mrb[9].mxu1 }
 0x162   : > { %556 = vst [vmem:[%s1260_s19 + $0x48] sm:$0xff] %v460_v46  ;;  %v462_v48 = vpop.f32.mrb[10].mxu0  ;;  %580 = vst [vmem:[%s1260_s19 + $0x108] sm:$0xff] %v520_v47  ;;  %v522_v49 = vpop.f32.mrb[10].mxu1 }
 0x163   : > { %557 = vst [vmem:[%s1260_s19 + $0x50] sm:$0xff] %v462_v48  ;;  %v464_v50 = vpop.f32.mrb[11].mxu0  ;;  %581 = vst [vmem:[%s1260_s19 + $0x110] sm:$0xff] %v522_v49  ;;  %v524_v51 = vpop.f32.mrb[11].mxu1 }
 0x164   : > { %558 = vst [vmem:[%s1260_s19 + $0x58] sm:$0xff] %v464_v50  ;;  %582 = vst [vmem:[%s1260_s19 + $0x118] sm:$0xff] %v524_v51 }
 0x168   : > { %v468_v52 = vpop.f32.mrb[12].mxu0  ;;  %v528_v53 = vpop.f32.mrb[12].mxu1 }
 0x169   : > { %559 = vst [vmem:[%s1260_s19 + $0x60] sm:$0xff] %v468_v52  ;;  %v470_v54 = vpop.f32.mrb[13].mxu0  ;;  %583 = vst [vmem:[%s1260_s19 + $0x120] sm:$0xff] %v528_v53  ;;  %v530_v55 = vpop.f32.mrb[13].mxu1 }
 0x16a   : > { %560 = vst [vmem:[%s1260_s19 + $0x68] sm:$0xff] %v470_v54  ;;  %v472_v56 = vpop.f32.mrb[14].mxu0  ;;  %584 = vst [vmem:[%s1260_s19 + $0x128] sm:$0xff] %v530_v55  ;;  %v532_v57 = vpop.f32.mrb[14].mxu1 }
 0x16b   : > { %561 = vst [vmem:[%s1260_s19 + $0x70] sm:$0xff] %v472_v56  ;;  %v474_v58 = vpop.f32.mrb[15].mxu0  ;;  %585 = vst [vmem:[%s1260_s19 + $0x130] sm:$0xff] %v532_v57  ;;  %v534_v59 = vpop.f32.mrb[15].mxu1 }
 0x16c   : > { %562 = vst [vmem:[%s1260_s19 + $0x78] sm:$0xff] %v474_v58  ;;  %586 = vst [vmem:[%s1260_s19 + $0x138] sm:$0xff] %v534_v59 }
 0x170   : > { %v478_v60 = vpop.f32.mrb[16].mxu0  ;;  %v538_v61 = vpop.f32.mrb[16].mxu1 }
 0x171   : > { %563 = vst [vmem:[%s1260_s19 + $0x80] sm:$0xff] %v478_v60  ;;  %v480_v62 = vpop.f32.mrb[17].mxu0  ;;  %587 = vst [vmem:[%s1260_s19 + $0x140] sm:$0xff] %v538_v61  ;;  %v540_v63 = vpop.f32.mrb[17].mxu1 }
 0x172   : > { %564 = vst [vmem:[%s1260_s19 + $0x88] sm:$0xff] %v480_v62  ;;  %v482_v0 = vpop.f32.mrb[18].mxu0  ;;  %588 = vst [vmem:[%s1260_s19 + $0x148] sm:$0xff] %v540_v63  ;;  %v542_v1 = vpop.f32.mrb[18].mxu1 }
 0x173   : > { %565 = vst [vmem:[%s1260_s19 + $0x90] sm:$0xff] %v482_v0  ;;  %v484_v2 = vpop.f32.mrb[19].mxu0  ;;  %589 = vst [vmem:[%s1260_s19 + $0x150] sm:$0xff] %v542_v1  ;;  %v544_v3 = vpop.f32.mrb[19].mxu1 }
 0x174   : > { %566 = vst [vmem:[%s1260_s19 + $0x98] sm:$0xff] %v484_v2  ;;  %590 = vst [vmem:[%s1260_s19 + $0x158] sm:$0xff] %v544_v3 }
 0x178   : > { %v488_v4 = vpop.f32.mrb[20].mxu0 }
 0x179   : > { %567 = vst [vmem:[%s1260_s19 + $0xa0] sm:$0xff] %v488_v4  ;;  %v490_v5 = vpop.f32.mrb[21].mxu0 }
 0x17a   : > { %568 = vst [vmem:[%s1260_s19 + $0xa8] sm:$0xff] %v490_v5  ;;  %v492_v6 = vpop.f32.mrb[22].mxu0 }
 0x17b   : > { %569 = vst [vmem:[%s1260_s19 + $0xb0] sm:$0xff] %v492_v6  ;;  %v494_v7 = vpop.f32.mrb[23].mxu0 }
 0x17c   : > { %570 = vst [vmem:[%s1260_s19 + $0xb8] sm:$0xff] %v494_v7 }
 0x17d   : > { %963 = shalt.err (!%p960_p6)
}
 0x17e   : > { %s964_s24 = scalar_lea.hbm %s1307_s8, 5632  ;;  %s968_s30 = scalar_lea.hbm %s1364_s2, 11264 }
 0x17f   : > { %p965_p0 = scmp.ne.s32.totalorder %s1307_s8, %s964_s24  ;;  %p969_p12 = scmp.lt.u32.totalorder %s1307_s8, %s1364_s2 }
 0x180   : > { %p970_p5 = scmp.lt.u32.totalorder %s968_s30, %s964_s24  ;;  %p972_p9 = scmp.lt.u32.totalorder %s964_s24, %s1307_s8 }
 0x181   : > { %p966_p2 = pnand %p965_p0, %p1383_p11 }
 0x182   : > { %p971_p8 = por %p970_p5, %p969_p12 }
 0x183   : > { %p967_p7 = pneg %p966_p2 }
 0x184   : > { %p973_p13 = por %p972_p9, %p971_p8 }
 0x186   : > { %p974_p4 = pnand %p973_p13, %p967_p7 }
 0x188   : > { %977 = shalt.err (!%p974_p4)
}
 0x189   : > { %s1047_s17 = smov 256   ;;  %s1048_s19 = smov 512  }
 0x18a   : > { %s1049_s22 = smov 16  }
 0x18b   : > { %781 = dma.vmem_to_hbm [thread:$0]  (%p1383_p11), %s1310_s26, 5632, %s1307_s8, %s592_s12, %s1047_s17, %s1048_s19, %s1049_s22  }
 0x18c PF: > { %s623_s25 = sand.u32 1, %s1016_s9   ;;  %p1384_p1 = scmp.ne.s32.totalorder %s1375_s21, 0 }
 0x18d   : > { %p1385_p10 = scmp.ge.s32.totalorder %s1036_s14, 2  ;;  %s624_s6 = scalar_lea.sflag [#allocation4], %s623_s25 }
 0x18f   : > { %p792_p3 = pnand %p1385_p10, %p1384_p1 }
 0x191   : > { %1011 = dma.done.wait (!%p792_p3), %s624_s6, 5632  }
 0x192   : > { %1013 = vsyncadd (!%p792_p3), %s624_s6, 4294961664  ;;  %s19_s14 = sadd.s32 1, %s1036_s14   ;;  %s1386_s9 = smov %s1020_s10 }
 0x193   : > { %p16_p6 = scmp.ge.s32.totalorder %s19_s14, 4   ;;  %s1387_s10 = smov %s1024_s11 }
 0x194   : > { %s1388_s11 = smov %s1183_s7  ;;  %s1389_s12 = smov %s1032_s13 }
 0x195   : > { %s1390_s13 = smov %s1392_s27  ;;  %18 = sbr.rel (!%p16_p6) target bundleno = 7 (0x7), region = 79 }
 0x19c   :  { %629 = vsyncpa [#allocation3], 1 }
 0x19d   :  { %631 = vsyncpa [#allocation3 + $0x1], 1 }
 0x19e   :  { %632 = vsyncpa [#allocation6], 1 }
 0x19f   :  { %634 = vsyncpa [#allocation6 + $0x1], 1 }
 0x1a0   :  { %635 = vsyncpa [#allocation4], 1 }
 0x1a1   :  { %637 = vsyncpa [#allocation4 + $0x1], 1 }

// kernel: _lambda_.5
= control target key start
LH: loop header
LB: loop body
LE: loop exit
PB: predicated region body
PF: predicated region fallthrough
CT: control target
= control target key end

     0   :  { %7 = vsyncpa [#allocation3], 0  ;;  %s1783_s0 = inlined_call_operand.hbm [shape: bf16[64,512], index: 0, kind: input, shape index: {}]   ;;  %s1784_s1 = inlined_call_operand.hbm [shape: bf16[512,512], index: 1, kind: input, shape index: {}]   ;;  %s1785_s2 = inlined_call_operand.hbm [shape: f32[64,512], index: 2, kind: output, shape index: {}]  }
   0x1   :  { %8 = vsyncpa [#allocation6], 0 }
   0x2   :  { %10 = vsyncpa [#allocation6 + $0x1], 0 }
   0x3   :  { %11 = vsyncpa [#allocation4], 0 }
   0x4   :  { %13 = vsyncpa [#allocation4 + $0x1], 0  ;;  %s1474_s9 = smov 0   ;;  %s1476_s10 = smov 0  }
   0x5   :  { %s1478_s11 = smov 0   ;;  %s1480_s12 = smov 0  }
   0x6   :  { %s1482_s13 = smov 0   ;;  %s1484_s14 = smov 0  }
   0x7 LB: > { %s988_s15 = sadd.s32 4294967295, %s1447_s14   ;;  %s989_s16 = sadd.s32 4294967294, %s1447_s14   ;;  %s1447_s14 = sphi %s1484_s14, %s19_s14   ;;  %s1443_s13 = sphi %s1482_s13, %s1811_s13   ;;  %s1439_s12 = sphi %s1480_s12, %s1810_s12   ;;  %s1435_s11 = sphi %s1478_s11, %s1809_s11   ;;  %s1431_s10 = sphi %s1476_s10, %s1808_s10   ;;  %s1427_s9 = sphi %s1474_s9, %s1807_s9  }
   0x8   : > { %p82_p0 = scmp.ne.s32.totalorder %s1435_s11, %s1431_s10  ;;  %p83_p1 = scmp.eq.s32.totalorder %s1447_s14, 0 }
   0x9   : > { %p88_p2 = scmp.ne.s32.totalorder %s1431_s10, %s1427_s9  ;;  %p1511_p3 = scmp.eq.s32.totalorder %s988_s15, 0 }
   0xa   : > { %p1515_p4 = por %p83_p1, %p82_p0  ;;  %p114_p5 = scmp.eq.s32.totalorder %s988_s15, 1 }
   0xb   : > { %s1792_s17 = scalar_select %p1511_p3, 1, 0 }
   0xc   : > { %p1521_p6 = por %p1511_p3, %p88_p2  ;;  %p120_p7 = scmp.eq.s32.totalorder %s989_s16, 1 }
   0xd   : > { %p1525_p8 = por %p114_p5, %p82_p0  ;;  %p990_p9 = scmp.ge.s32.totalorder %s1447_s14, 1 }
   0xe   : > { %s1794_s19 = scalar_select %p1521_p6, 1, 0 }
   0xf   : > { %s1795_s20 = scalar_select %p1525_p8, 1, 0 }
  0x10   : > { %p1530_p10 = por %p120_p7, %p88_p2  ;;  %p127_p11 = scmp.lt.s32.totalorder %s1447_s14, 3 }
  0x11   : > { %s1449_s23 = smov [#allocation2]   ;;  %p1124_p1 = scmp.lt.s32.totalorder %s1447_s14, 2 }
  0x12   : > { %s1796_s21 = scalar_select %p1530_p10, 1, 0 }
  0x13   : > { %p1535_p12 = pnand %p990_p9, %p127_p11  ;;  %s145_s24 = sshll.u32 %s1449_s23, 4  ;;  %s1539_s24 = int_to_ptr.vmem [resolvable:$true] %s145_s24 }
  0x14   : > { %p1553_p2 = pnand %p1124_p1, %p1515_p4  ;;  %s34_s27 = sadd.s32 1, %s1443_s13 }
  0x15   : > { %s1797_s22 = scalar_select %p1535_p12, 1, 0 }
  0x16   : > { %p1111_p13 = pneg %p1535_p12  ;;  %s1303_s30 = scalar_lea.hbm %s1783_s0, 2048 }
  0x17   : > { %s1799_s26 = scalar_select %p1553_p2, 1, 0 }
  0x18   : > { %p1547_p5 = pnand %p1111_p13, %p1511_p3  ;;  %p1304_p7 = scmp.ne.s32.totalorder %s1783_s0, %s1303_s30 }
  0x19   : > { %p1310_p4 = scmp.lt.u32.totalorder %s1303_s30, %s1783_s0 }
  0x1a   : > { %p1305_p9 = pneg %p1547_p5 }
  0x1c   : > { %p1306_p11 = pnand %p1305_p9, %p1304_p7 }
  0x1e   : > { %p1307_p13 = pneg %p1306_p11 }
  0x20   : > { %p1312_p1 = pnand %p1310_p4, %p1307_p13 }
  0x22   : > { %1315 = shalt.err (!%p1312_p1)
}
  0x23   : > { %s1316_s7 = scalar_lea.vmem %s1539_s24, 2048  ;;  %p1324_p6 = scmp.lt.s32.totalorder %s1539_s24, %s1539_s24 }
  0x24   : > { %p1317_p0 = scmp.ne.s32.totalorder %s1539_s24, %s1316_s7  ;;  %p1325_p3 = scmp.lt.s32.totalorder %s1316_s7, %s1316_s7 }
  0x26   : > { %p1319_p10 = pnand %p1317_p0, %p1305_p9  ;;  %p1326_p12 = por %p1325_p3, %p1324_p6 }
  0x28   : > { %p1320_p8 = pneg %p1319_p10 }
  0x2a   : > { %p1327_p2 = pnand %p1326_p12, %p1320_p8 }
  0x2c   : > { %1330 = shalt.err (!%p1327_p2)
}
  0x2d   : > { %s1450_s8 = smov 256   ;;  %s1451_s15 = smov 16  }
  0x2e   : > { %1114 = dma.hbm_to_vmem [thread:$0]  (!%p1547_p5), %s1783_s0, 2048, %s1539_s24, [#allocation3], %s1450_s8, %s1450_s8, %s1451_s15  }
  0x2f   : > { %p36_p10 = scmp.ge.s32.totalorder %s34_s27, 2  ;;  %s75_s23 = sadd.s32 1, %s1435_s11 }
  0x30   : > { %s159_s28 = sand.u32 1, %s1435_s11   ;;  %s1085_s3 = sshll.u32 %s1443_s13, 7 }
  0x31   : > { %s1813_s27 = smov (%p36_p10, %s34_s27), 0  ;;  %s993_s29 = sshll.u32 %s159_s28, 9 }
  0x32   : > { %s71_s30 = ssub.s32 %s1443_s13, %s1813_s27  ;;  %s1591_s5 = scalar_lea.hbm %s1784_s1, %s1085_s3 }
  0x33   : > { %p73_p3 = scmp.eq.s32.totalorder %s71_s30, 0  ;;  %s163_s24 = scalar_lea.vmem [#allocation5], %s993_s29 }
  0x34   : > { %s173_s6 = sshll.u32 %s163_s24, 4  ;;  %s1598_s15 = scalar_lea.sflag [#allocation6], %s159_s28  ;;  %s1596_s6 = int_to_ptr.vmem [resolvable:$true] %s173_s6 }
  0x35   : > { %s1594_s7 = scalar_select %p73_p3, %s1435_s11, %s75_s23  }
  0x36   : > { %s1331_s16 = scalar_lea.hbm %s1591_s5, 8192  ;;  %p1800_p8 = scmp.ne.s32.totalorder %s1799_s26, 0 }
  0x37   : > { %p1332_p6 = scmp.ne.s32.totalorder %s1591_s5, %s1331_s16  ;;  %s1336_s3 = scalar_lea.hbm %s1784_s1, 16384 }
  0x38   : > { %p1333_p12 = pneg %p1800_p8  ;;  %p1337_p2 = scmp.lt.u32.totalorder %s1591_s5, %s1784_s1 }
  0x39   : > { %p1338_p7 = scmp.lt.u32.totalorder %s1336_s3, %s1331_s16  ;;  %p1340_p11 = scmp.lt.u32.totalorder %s1331_s16, %s1591_s5 }
  0x3a   : > { %p1334_p0 = pnand %p1333_p12, %p1332_p6 }
  0x3b   : > { %p1339_p9 = por %p1338_p7, %p1337_p2 }
  0x3c   : > { %p1335_p5 = pneg %p1334_p0 }
  0x3d   : > { %p1341_p13 = por %p1340_p11, %p1339_p9 }
  0x3f   : > { %p1342_p4 = pnand %p1341_p13, %p1335_p5 }
  0x41   : > { %1345 = shalt.err (!%p1342_p4)
}
  0x42   : > { %s1346_s23 = scalar_lea.vmem %s1596_s6, 8192  ;;  %s1452_s28 = smov [#allocation5]  }
  0x43   : > { %p1347_p1 = scmp.ne.s32.totalorder %s1596_s6, %s1346_s23  ;;  %s1351_s25 = sshll.u32 %s1452_s28, 4  ;;  %s1352_s25 = int_to_ptr.vmem [resolvable:$false] %s1351_s25 }
  0x44   : > { %s1353_s24 = scalar_lea.vmem %s1352_s25, 16384  ;;  %p1354_p6 = scmp.lt.s32.totalorder %s1596_s6, %s1352_s25 }
  0x45   : > { %p1349_p10 = pnand %p1347_p1, %p1333_p12  ;;  %p1355_p0 = scmp.lt.s32.totalorder %s1353_s24, %s1346_s23 }
  0x47   : > { %p1350_p3 = pneg %p1349_p10  ;;  %p1356_p2 = por %p1355_p0, %p1354_p6 }
  0x49   : > { %p1357_p7 = pnand %p1356_p2, %p1350_p3 }
  0x4b   : > { %1360 = shalt.err (!%p1357_p7)
}
  0x4c   : > { %s1453_s16 = smov 128   ;;  %s1454_s18 = smov 8  }
  0x4d   : > { %1118 = dma.hbm_to_vmem [thread:$0]  (!%p1800_p8), %s1591_s5, 8192, %s1596_s6, %s1598_s15, %s1450_s8, %s1453_s16, %s1454_s18  }
  0x4e   : > { %p1801_p12 = scmp.ne.s32.totalorder %s1797_s22, 0 }
  0x4f   : > { %p1802_p5 = scmp.ne.s32.totalorder (!%p1801_p12), %s1792_s17, 0 }
  0x50   : > { %185 = sbr.rel (%p1801_p12) target bundleno = 415 (0x19f), region = 28 }
  0x57   : > { %1414 = dma.done.wait (%p1802_p5), [#allocation3], 2048  }
  0x58   : > { %1416 = vsyncadd (%p1802_p5), [#allocation3], 4294965248  ;;  %s1634_s30 = sand.u32 1, %s1431_s10   ;;  %p1803_p8 = scmp.ne.s32.totalorder %s1794_s19, 0 }
  0x59   : > { %s998_s3 = sshll.u32 %s1634_s30, 9  ;;  %s192_s29 = scalar_lea.sflag [#allocation6], %s1634_s30 }
  0x5a   : > { %s1638_s26 = scalar_lea.vmem [#allocation5], %s998_s3 }
  0x5b   : > { %1418 = dma.done.wait (%p1803_p8), %s192_s29, 8192  }
  0x5c   : > { %1420 = vsyncadd (%p1803_p8), %s192_s29, 4294959104  ;;  %v1183_v0 = vld [vmem:[%s1638_s26 + $0x4] ss:$8 sps:$4 sm:$0xff]   ;;  %v1187_v2 = vld [vmem:[%s1638_s26] ss:$8 sps:$4 sm:$0xff]   ;;  %s999_s17 = sshll.u32 %s1634_s30, 7 }
  0x5d   : > { %v1185_v1 = vld [vmem:[%s1638_s26 + $0x104] ss:$8 sps:$4 sm:$0xff]   ;;  %702 = vmatprep.subr.bf16.mxu1 %v1183_v0  ;;  %v1188_v3 = vld [vmem:[%s1638_s26 + $0x100] ss:$8 sps:$4 sm:$0xff]   ;;  %v1189_v4 = vld [vmem:[%s1638_s26 + $0x14] ss:$8 sps:$4 sm:$0xff]  }
  0x5e   : > { %775 = vmatprep.subr.bf16.mxu0 %v1185_v1  ;;  %703 = vmatpush1.bf16.msra.mxu1 %v1187_v2  ;;  %v1191_v5 = vld [vmem:[%s1638_s26 + $0x114] ss:$8 sps:$4 sm:$0xff]   ;;  %v1193_v6 = vld [vmem:[%s1638_s26 + $0x10] ss:$8 sps:$4 sm:$0xff]   ;;  %v1195_v8 = vld [vmem:[%s1638_s26 + $0x24] ss:$8 sps:$4 sm:$0xff]  }
  0x5f   : > { %776 = vmatpush1.bf16.msra.mxu0 %v1188_v3  ;;  %704 = vmatprep.subr.bf16.mxu1 %v1189_v4  ;;  %v1194_v7 = vld [vmem:[%s1638_s26 + $0x110] ss:$8 sps:$4 sm:$0xff]   ;;  %v1197_v9 = vld [vmem:[%s1638_s26 + $0x124] ss:$8 sps:$4 sm:$0xff]   ;;  %v1199_v10 = vld [vmem:[%s1638_s26 + $0x20] ss:$8 sps:$4 sm:$0xff]  }
  0x60   : > { %777 = vmatprep.subr.bf16.mxu0 %v1191_v5  ;;  %v1200_v11 = vld [vmem:[%s1638_s26 + $0x120] ss:$8 sps:$4 sm:$0xff]   ;;  %v1201_v12 = vld [vmem:[%s1638_s26 + $0x34] ss:$8 sps:$4 sm:$0xff]   ;;  %v1205_v14 = vld [vmem:[%s1638_s26 + $0x30] ss:$8 sps:$4 sm:$0xff]  }
  0x61   : > { %v1203_v13 = vld [vmem:[%s1638_s26 + $0x134] ss:$8 sps:$4 sm:$0xff]   ;;  %v1206_v15 = vld [vmem:[%s1638_s26 + $0x130] ss:$8 sps:$4 sm:$0xff]   ;;  %v1207_v16 = vld [vmem:[%s1638_s26 + $0x44] ss:$8 sps:$4 sm:$0xff]  }
  0x62   : > { %705 = vmatpush1.bf16.msra.mxu1 %v1193_v6  ;;  %v1209_v17 = vld [vmem:[%s1638_s26 + $0x144] ss:$8 sps:$4 sm:$0xff]   ;;  %v1211_v18 = vld [vmem:[%s1638_s26 + $0x40] ss:$8 sps:$4 sm:$0xff]   ;;  %v1213_v20 = vld [vmem:[%s1638_s26 + $0x54] ss:$8 sps:$4 sm:$0xff]  }
  0x63   : > { %778 = vmatpush1.bf16.msra.mxu0 %v1194_v7  ;;  %706 = vmatprep.subr.bf16.mxu1 %v1195_v8  ;;  %v1212_v19 = vld [vmem:[%s1638_s26 + $0x140] ss:$8 sps:$4 sm:$0xff]   ;;  %v1215_v21 = vld [vmem:[%s1638_s26 + $0x154] ss:$8 sps:$4 sm:$0xff]   ;;  %v1217_v22 = vld [vmem:[%s1638_s26 + $0x50] ss:$8 sps:$4 sm:$0xff]  }
  0x64   : > { %779 = vmatprep.subr.bf16.mxu0 %v1197_v9  ;;  %v1218_v23 = vld [vmem:[%s1638_s26 + $0x150] ss:$8 sps:$4 sm:$0xff]   ;;  %v1219_v24 = vld [vmem:[%s1638_s26 + $0x64] ss:$8 sps:$4 sm:$0xff]   ;;  %v1223_v26 = vld [vmem:[%s1638_s26 + $0x60] ss:$8 sps:$4 sm:$0xff]  }
  0x65   : > { %v1221_v25 = vld [vmem:[%s1638_s26 + $0x164] ss:$8 sps:$4 sm:$0xff]   ;;  %v1224_v27 = vld [vmem:[%s1638_s26 + $0x160] ss:$8 sps:$4 sm:$0xff]   ;;  %v1225_v28 = vld [vmem:[%s1638_s26 + $0x74] ss:$8 sps:$4 sm:$0xff]  }
  0x66   : > { %707 = vmatpush1.bf16.msra.mxu1 %v1199_v10  ;;  %v1227_v29 = vld [vmem:[%s1638_s26 + $0x174] ss:$8 sps:$4 sm:$0xff]   ;;  %v1229_v30 = vld [vmem:[%s1638_s26 + $0x70] ss:$8 sps:$4 sm:$0xff]   ;;  %v1231_v32 = vld [vmem:[%s1638_s26 + $0x84] ss:$8 sps:$4 sm:$0xff]  }
  0x67   : > { %780 = vmatpush1.bf16.msra.mxu0 %v1200_v11  ;;  %708 = vmatprep.subr.bf16.mxu1 %v1201_v12  ;;  %v1230_v31 = vld [vmem:[%s1638_s26 + $0x170] ss:$8 sps:$4 sm:$0xff]   ;;  %v1233_v33 = vld [vmem:[%s1638_s26 + $0x184] ss:$8 sps:$4 sm:$0xff]   ;;  %v1235_v34 = vld [vmem:[%s1638_s26 + $0x80] ss:$8 sps:$4 sm:$0xff]  }
  0x68   : > { %781 = vmatprep.subr.bf16.mxu0 %v1203_v13  ;;  %v1236_v35 = vld [vmem:[%s1638_s26 + $0x180] ss:$8 sps:$4 sm:$0xff]   ;;  %v1237_v36 = vld [vmem:[%s1638_s26 + $0x94] ss:$8 sps:$4 sm:$0xff]   ;;  %v1241_v38 = vld [vmem:[%s1638_s26 + $0x90] ss:$8 sps:$4 sm:$0xff]  }
  0x69   : > { %v1239_v37 = vld [vmem:[%s1638_s26 + $0x194] ss:$8 sps:$4 sm:$0xff]   ;;  %v1242_v39 = vld [vmem:[%s1638_s26 + $0x190] ss:$8 sps:$4 sm:$0xff]   ;;  %v1243_v40 = vld [vmem:[%s1638_s26 + $0xa4] ss:$8 sps:$4 sm:$0xff]  }
  0x6a   : > { %709 = vmatpush1.bf16.msra.mxu1 %v1205_v14  ;;  %v1245_v41 = vld [vmem:[%s1638_s26 + $0x1a4] ss:$8 sps:$4 sm:$0xff]   ;;  %v1247_v42 = vld [vmem:[%s1638_s26 + $0xa0] ss:$8 sps:$4 sm:$0xff]   ;;  %v1249_v44 = vld [vmem:[%s1638_s26 + $0xb4] ss:$8 sps:$4 sm:$0xff]  }
  0x6b   : > { %782 = vmatpush1.bf16.msra.mxu0 %v1206_v15  ;;  %710 = vmatprep.subr.bf16.mxu1 %v1207_v16  ;;  %v1248_v43 = vld [vmem:[%s1638_s26 + $0x1a0] ss:$8 sps:$4 sm:$0xff]   ;;  %v1251_v45 = vld [vmem:[%s1638_s26 + $0x1b4] ss:$8 sps:$4 sm:$0xff]   ;;  %v1253_v46 = vld [vmem:[%s1638_s26 + $0xb0] ss:$8 sps:$4 sm:$0xff]  }
  0x6c   : > { %783 = vmatprep.subr.bf16.mxu0 %v1209_v17  ;;  %v1254_v47 = vld [vmem:[%s1638_s26 + $0x1b0] ss:$8 sps:$4 sm:$0xff]   ;;  %v1255_v48 = vld [vmem:[%s1638_s26 + $0xc4] ss:$8 sps:$4 sm:$0xff]   ;;  %v1259_v52 = vld [vmem:[%s1638_s26 + $0xc0] ss:$8 sps:$4 sm:$0xff]  }
  0x6d   : > { %v1281_v49 = vld [vmem:[#allocation2 + $0x4] ss:$16 sps:$4 sm:$0xff]   ;;  %v1284_v51 = vld [vmem:[#allocation2 + $0xc] ss:$16 sps:$4 sm:$0xff]   ;;  %v1260_v53 = vld [vmem:[%s1638_s26 + $0x1c0] ss:$8 sps:$4 sm:$0xff]  }
  0x6e   : > { %711 = vmatpush1.bf16.msra.mxu1 %v1211_v18  ;;  %v1257_v50 = vld [vmem:[%s1638_s26 + $0x1c4] ss:$8 sps:$4 sm:$0xff]   ;;  %734 = vmatprep.mubr.bf16.mxu1 %v1281_v49  ;;  %v1261_v54 = vld [vmem:[%s1638_s26 + $0xd4] ss:$8 sps:$4 sm:$0xff]   ;;  %v1265_v56 = vld [vmem:[%s1638_s26 + $0xd0] ss:$8 sps:$4 sm:$0xff]  }
  0x6f   : > { %784 = vmatpush1.bf16.msra.mxu0 %v1212_v19  ;;  %712 = vmatprep.subr.bf16.mxu1 %v1213_v20  ;;  %v1263_v55 = vld [vmem:[%s1638_s26 + $0x1d4] ss:$8 sps:$4 sm:$0xff]   ;;  %v1266_v57 = vld [vmem:[%s1638_s26 + $0x1d0] ss:$8 sps:$4 sm:$0xff]   ;;  %v1267_v58 = vld [vmem:[%s1638_s26 + $0xe4] ss:$8 sps:$4 sm:$0xff]  }
  0x70   : > { %785 = vmatprep.subr.bf16.mxu0 %v1215_v21  ;;  %807 = vmatprep.mubr.bf16.mxu0 %v1284_v51  ;;  %v1269_v59 = vld [vmem:[%s1638_s26 + $0x1e4] ss:$8 sps:$4 sm:$0xff]   ;;  %v1271_v60 = vld [vmem:[%s1638_s26 + $0xe0] ss:$8 sps:$4 sm:$0xff]   ;;  %v1273_v62 = vld [vmem:[%s1638_s26 + $0xf4] ss:$8 sps:$4 sm:$0xff]  }
  0x71   : > { %v1272_v61 = vld [vmem:[%s1638_s26 + $0x1e0] ss:$8 sps:$4 sm:$0xff]   ;;  %v1275_v63 = vld [vmem:[%s1638_s26 + $0x1f4] ss:$8 sps:$4 sm:$0xff]   ;;  %v1277_v0 = vld [vmem:[%s1638_s26 + $0xf0] ss:$8 sps:$4 sm:$0xff]  }
  0x72   : > { %713 = vmatpush1.bf16.msra.mxu1 %v1217_v22  ;;  %v1278_v1 = vld [vmem:[%s1638_s26 + $0x1f0] ss:$8 sps:$4 sm:$0xff]   ;;  %v1285_v4 = vld [vmem:[#allocation2 + $0x24] ss:$16 sps:$4 sm:$0xff]   ;;  %v1287_v5 = vld [vmem:[#allocation2 + $0x2c] ss:$16 sps:$4 sm:$0xff]  }
  0x73   : > { %786 = vmatpush1.bf16.msra.mxu0 %v1218_v23  ;;  %714 = vmatprep.subr.bf16.mxu1 %v1219_v24  ;;  %v1279_v2 = vld [vmem:[#allocation2] ss:$16 sps:$4 sm:$0xff]   ;;  %v1282_v3 = vld [vmem:[#allocation2 + $0x8] ss:$16 sps:$4 sm:$0xff]   ;;  %v1291_v8 = vld [vmem:[#allocation2 + $0x44] ss:$16 sps:$4 sm:$0xff]  }
  0x74   : > { %787 = vmatprep.subr.bf16.mxu0 %v1221_v25  ;;  %v1289_v6 = vld [vmem:[#allocation2 + $0x20] ss:$16 sps:$4 sm:$0xff]   ;;  %v1290_v7 = vld [vmem:[#allocation2 + $0x28] ss:$16 sps:$4 sm:$0xff]   ;;  %v1293_v9 = vld [vmem:[#allocation2 + $0x4c] ss:$16 sps:$4 sm:$0xff]  }
  0x75   : > { %v1295_v10 = vld [vmem:[#allocation2 + $0x40] ss:$16 sps:$4 sm:$0xff]   ;;  %v1296_v11 = vld [vmem:[#allocation2 + $0x48] ss:$16 sps:$4 sm:$0xff]   ;;  %v1297_v12 = vld [vmem:[#allocation2 + $0x64] ss:$16 sps:$4 sm:$0xff]  }
  0x76   : > { %715 = vmatpush1.bf16.msra.mxu1 %v1223_v26  ;;  %v1299_v13 = vld [vmem:[#allocation2 + $0x6c] ss:$16 sps:$4 sm:$0xff]   ;;  %v1301_v14 = vld [vmem:[#allocation2 + $0x60] ss:$16 sps:$4 sm:$0xff]   ;;  %v1302_v15 = vld [vmem:[#allocation2 + $0x68] ss:$16 sps:$4 sm:$0xff]  }
  0x77   : > { %788 = vmatpush1.bf16.msra.mxu0 %v1224_v27  ;;  %716 = vmatprep.subr.bf16.mxu1 %v1225_v28  ;;  %s1709_s19 = scalar_lea.vmem [#allocation7], %s999_s17  ;;  %s1086_s22 = sshll.u32 %s1439_s12, 8 }
  0x78   : > { %789 = vmatprep.subr.bf16.mxu0 %v1227_v29  ;;  %s881_s8 = sshll.u32 %s1709_s19, 4  ;;  %s1728_s15 = scalar_lea.hbm %s1785_s2, %s1086_s22  ;;  %s1731_s8 = int_to_ptr.vmem [resolvable:$true] %s881_s8 }
  0x79   : > { %s865_s12 = scalar_lea.sflag [#allocation4], %s1634_s30  ;;  %s1361_s4 = scalar_lea.vmem %s1731_s8, 2048 }
  0x7a   : > { %717 = vmatpush1.bf16.msra.mxu1 %v1229_v30  ;;  %p1362_p9 = scmp.ne.s32.totalorder %s1731_s8, %s1361_s4  ;;  %p1804_p11 = scmp.ne.s32.totalorder %s1795_s20, 0 }
  0x7b   : > { %790 = vmatpush1.bf16.msra.mxu0 %v1230_v31  ;;  %718 = vmatprep.subr.bf16.mxu1 %v1231_v32  ;;  %s1455_s23 = smov [#allocation7]  }
  0x7c   : > { %791 = vmatprep.subr.bf16.mxu0 %v1233_v33  ;;  %p1363_p13 = pnand %p1362_p9, %p1804_p11  ;;  %s1365_s28 = sshll.u32 %s1455_s23, 4  ;;  %s1366_s28 = int_to_ptr.vmem [resolvable:$false] %s1365_s28 }
  0x7d   : > { %s1367_s25 = scalar_lea.vmem %s1366_s28, 4096  ;;  %p1368_p1 = scmp.lt.s32.totalorder %s1731_s8, %s1366_s28 }
  0x7e   : > { %719 = vmatpush1.bf16.msra.mxu1 %v1235_v34  ;;  %p1364_p4 = pneg %p1363_p13  ;;  %p1369_p10 = scmp.lt.s32.totalorder %s1367_s25, %s1361_s4 }
  0x7f   : > { %792 = vmatpush1.bf16.msra.mxu0 %v1236_v35  ;;  %720 = vmatprep.subr.bf16.mxu1 %v1237_v36 }
  0x80   : > { %793 = vmatprep.subr.bf16.mxu0 %v1239_v37  ;;  %p1370_p3 = por %p1369_p10, %p1368_p1 }
  0x82   : > { %721 = vmatpush1.bf16.msra.mxu1 %v1241_v38  ;;  %p1371_p6 = pnand %p1370_p3, %p1364_p4 }
  0x83   : > { %794 = vmatpush1.bf16.msra.mxu0 %v1242_v39  ;;  %722 = vmatprep.subr.bf16.mxu1 %v1243_v40 }
  0x84   : > { %795 = vmatprep.subr.bf16.mxu0 %v1245_v41 }
  0x86   : > { %723 = vmatpush1.bf16.msra.mxu1 %v1247_v42 }
  0x87   : > { %796 = vmatpush1.bf16.msra.mxu0 %v1248_v43  ;;  %724 = vmatprep.subr.bf16.mxu1 %v1249_v44 }
  0x88   : > { %797 = vmatprep.subr.bf16.mxu0 %v1251_v45 }
  0x8a   : > { %725 = vmatpush1.bf16.msra.mxu1 %v1253_v46 }
  0x8b   : > { %798 = vmatpush1.bf16.msra.mxu0 %v1254_v47  ;;  %726 = vmatprep.subr.bf16.mxu1 %v1255_v48 }
  0x8c   : > { %799 = vmatprep.subr.bf16.mxu0 %v1257_v50 }
  0x8e   : > { %727 = vmatpush1.bf16.msra.mxu1 %v1259_v52 }
  0x8f   : > { %800 = vmatpush1.bf16.msra.mxu0 %v1260_v53  ;;  %728 = vmatprep.subr.bf16.mxu1 %v1261_v54 }
  0x90   : > { %801 = vmatprep.subr.bf16.mxu0 %v1263_v55 }
  0x92   : > { %729 = vmatpush1.bf16.msra.mxu1 %v1265_v56 }
  0x93   : > { %802 = vmatpush1.bf16.msra.mxu0 %v1266_v57  ;;  %730 = vmatprep.subr.bf16.mxu1 %v1267_v58 }
  0x94   : > { %803 = vmatprep.subr.bf16.mxu0 %v1269_v59 }
  0x96   : > { %731 = vmatpush1.bf16.msra.mxu1 %v1271_v60 }
  0x97   : > { %804 = vmatpush1.bf16.msra.mxu0 %v1272_v61  ;;  %732 = vmatprep.subr.bf16.mxu1 %v1273_v62 }
  0x98   : > { %805 = vmatprep.subr.bf16.mxu0 %v1275_v63 }
  0x9a   : > { %733 = vmatpush1.bf16.msra.mxu1 %v1277_v0 }
  0x9b   : > { %806 = vmatpush1.bf16.msra.mxu0 %v1278_v1 }
  0x9d   : > { %735 = vmatmul.mubr.bf16.vlgmr.msra.gmra.mrb[0].mxu1 %v1279_v2 }
  0x9e   : > { %808 = vmatmul.mubr.bf16.vlgmr.msra.gmra.mrb[0].mxu0 %v1282_v3  ;;  %744 = vmatprep.mubr.bf16.mxu1 %v1285_v4 }
  0x9f   : > { %817 = vmatprep.mubr.bf16.mxu0 %v1287_v5 }
  0xa5   : > { %745 = vmatmul.mubr.bf16.gmra.mrb[4].mxu1 %v1289_v6 }
  0xa6   : > { %818 = vmatmul.mubr.bf16.gmra.mrb[4].mxu0 %v1290_v7  ;;  %754 = vmatprep.mubr.bf16.mxu1 %v1291_v8 }
  0xa7   : > { %827 = vmatprep.mubr.bf16.mxu0 %v1293_v9 }
  0xad   : > { %755 = vmatmul.mubr.bf16.gmra.mrb[8].mxu1 %v1295_v10 }
  0xae   : > { %828 = vmatmul.mubr.bf16.gmra.mrb[8].mxu0 %v1296_v11  ;;  %764 = vmatprep.mubr.bf16.mxu1 %v1297_v12 }
  0xaf   : > { %837 = vmatprep.mubr.bf16.mxu0 %v1299_v13 }
  0xb5   : > { %765 = vmatmul.mubr.bf16.gmra.mrb[12].mxu1 %v1301_v14 }
  0xb6   : > { %838 = vmatmul.mubr.bf16.gmra.mrb[12].mxu0 %v1302_v15 }
 0x170   : > { %v736_v16 = vpop.f32.mrb[0].mxu1 }
 0x171   : > { %v809_v17 = vpop.f32.mrb[0].mxu0  ;;  %v738_v19 = vpop.f32.mrb[1].mxu1 }
 0x172   : > { %v810_v18 = vadd.f32 %v809_v17, %v736_v16  ;;  %v811_v20 = vpop.f32.mrb[1].mxu0  ;;  %v740_v22 = vpop.f32.mrb[2].mxu1 }
 0x173   : > { %v812_v21 = vadd.f32 %v811_v20, %v738_v19  ;;  %v813_v23 = vpop.f32.mrb[2].mxu0  ;;  %v742_v25 = vpop.f32.mrb[3].mxu1 }
 0x174   : > { %848 = vst [vmem:[%s1709_s19] sm:$0xff] %v810_v18  ;;  %v814_v24 = vadd.f32 %v813_v23, %v740_v22  ;;  %v815_v26 = vpop.f32.mrb[3].mxu0 }
 0x175   : > { %849 = vst [vmem:[%s1709_s19 + $0x8] sm:$0xff] %v812_v21  ;;  %v816_v27 = vadd.f32 %v815_v26, %v742_v25 }
 0x176   : > { %850 = vst [vmem:[%s1709_s19 + $0x10] sm:$0xff] %v814_v24 }
 0x177   : > { %851 = vst [vmem:[%s1709_s19 + $0x18] sm:$0xff] %v816_v27 }
 0x178   : > { %v746_v28 = vpop.f32.mrb[4].mxu1 }
 0x179   : > { %v819_v29 = vpop.f32.mrb[4].mxu0  ;;  %v748_v31 = vpop.f32.mrb[5].mxu1 }
 0x17a   : > { %v820_v30 = vadd.f32 %v819_v29, %v746_v28  ;;  %v821_v32 = vpop.f32.mrb[5].mxu0  ;;  %v750_v34 = vpop.f32.mrb[6].mxu1 }
 0x17b   : > { %v822_v33 = vadd.f32 %v821_v32, %v748_v31  ;;  %v823_v35 = vpop.f32.mrb[6].mxu0  ;;  %v752_v37 = vpop.f32.mrb[7].mxu1 }
 0x17c   : > { %852 = vst [vmem:[%s1709_s19 + $0x20] sm:$0xff] %v820_v30  ;;  %v824_v36 = vadd.f32 %v823_v35, %v750_v34  ;;  %v825_v38 = vpop.f32.mrb[7].mxu0 }
 0x17d   : > { %853 = vst [vmem:[%s1709_s19 + $0x28] sm:$0xff] %v822_v33  ;;  %v826_v39 = vadd.f32 %v825_v38, %v752_v37 }
 0x17e   : > { %854 = vst [vmem:[%s1709_s19 + $0x30] sm:$0xff] %v824_v36 }
 0x17f   : > { %855 = vst [vmem:[%s1709_s19 + $0x38] sm:$0xff] %v826_v39 }
 0x180   : > { %v756_v40 = vpop.f32.mrb[8].mxu1 }
 0x181   : > { %v829_v41 = vpop.f32.mrb[8].mxu0  ;;  %v758_v43 = vpop.f32.mrb[9].mxu1 }
 0x182   : > { %v830_v42 = vadd.f32 %v829_v41, %v756_v40  ;;  %v831_v44 = vpop.f32.mrb[9].mxu0  ;;  %v760_v46 = vpop.f32.mrb[10].mxu1 }
 0x183   : > { %v832_v45 = vadd.f32 %v831_v44, %v758_v43  ;;  %v833_v47 = vpop.f32.mrb[10].mxu0  ;;  %v762_v49 = vpop.f32.mrb[11].mxu1 }
 0x184   : > { %856 = vst [vmem:[%s1709_s19 + $0x40] sm:$0xff] %v830_v42  ;;  %v834_v48 = vadd.f32 %v833_v47, %v760_v46  ;;  %v835_v50 = vpop.f32.mrb[11].mxu0 }
 0x185   : > { %857 = vst [vmem:[%s1709_s19 + $0x48] sm:$0xff] %v832_v45  ;;  %v836_v51 = vadd.f32 %v835_v50, %v762_v49 }
 0x186   : > { %858 = vst [vmem:[%s1709_s19 + $0x50] sm:$0xff] %v834_v48 }
 0x187   : > { %859 = vst [vmem:[%s1709_s19 + $0x58] sm:$0xff] %v836_v51 }
 0x188   : > { %v766_v52 = vpop.f32.mrb[12].mxu1 }
 0x189   : > { %v839_v53 = vpop.f32.mrb[12].mxu0  ;;  %v768_v55 = vpop.f32.mrb[13].mxu1 }
 0x18a   : > { %v840_v54 = vadd.f32 %v839_v53, %v766_v52  ;;  %v841_v56 = vpop.f32.mrb[13].mxu0  ;;  %v770_v58 = vpop.f32.mrb[14].mxu1 }
 0x18b   : > { %v842_v57 = vadd.f32 %v841_v56, %v768_v55  ;;  %v843_v59 = vpop.f32.mrb[14].mxu0  ;;  %v772_v61 = vpop.f32.mrb[15].mxu1 }
 0x18c   : > { %860 = vst [vmem:[%s1709_s19 + $0x60] sm:$0xff] %v840_v54  ;;  %v844_v60 = vadd.f32 %v843_v59, %v770_v58  ;;  %v845_v62 = vpop.f32.mrb[15].mxu0 }
 0x18d   : > { %861 = vst [vmem:[%s1709_s19 + $0x68] sm:$0xff] %v842_v57  ;;  %v846_v63 = vadd.f32 %v845_v62, %v772_v61 }
 0x18e   : > { %862 = vst [vmem:[%s1709_s19 + $0x70] sm:$0xff] %v844_v60 }
 0x18f   : > { %863 = vst [vmem:[%s1709_s19 + $0x78] sm:$0xff] %v846_v63 }
 0x190   : > { %1374 = shalt.err (!%p1371_p6)
}
 0x191   : > { %s1375_s24 = scalar_lea.hbm %s1728_s15, 2048  ;;  %s1379_s3 = scalar_lea.hbm %s1785_s2, 4096 }
 0x192   : > { %p1376_p0 = scmp.ne.s32.totalorder %s1728_s15, %s1375_s24  ;;  %p1380_p12 = scmp.lt.u32.totalorder %s1728_s15, %s1785_s2 }
 0x193   : > { %p1381_p5 = scmp.lt.u32.totalorder %s1379_s3, %s1375_s24  ;;  %p1383_p9 = scmp.lt.u32.totalorder %s1375_s24, %s1728_s15 }
 0x194   : > { %p1377_p2 = pnand %p1376_p0, %p1804_p11 }
 0x195   : > { %p1382_p8 = por %p1381_p5, %p1380_p12 }
 0x196   : > { %p1378_p7 = pneg %p1377_p2 }
 0x197   : > { %p1384_p13 = por %p1383_p9, %p1382_p8 }
 0x199   : > { %p1385_p4 = pnand %p1384_p13, %p1378_p7 }
 0x19b   : > { %1388 = shalt.err (!%p1385_p4)
}
 0x19c   : > { %s1456_s17 = smov 256   ;;  %s1457_s19 = smov 512  }
 0x19d   : > { %s1458_s22 = smov 16  }
 0x19e   : > { %1109 = dma.vmem_to_hbm [thread:$0]  (%p1804_p11), %s1731_s8, 2048, %s1728_s15, %s865_s12, %s1456_s17, %s1457_s19, %s1458_s22  }
 0x19f PF: > { %s896_s5 = sand.u32 1, %s1427_s9   ;;  %p1805_p1 = scmp.ne.s32.totalorder %s1796_s21, 0 }
 0x1a0   : > { %p1806_p10 = scmp.ge.s32.totalorder %s1447_s14, 2  ;;  %s897_s6 = scalar_lea.sflag [#allocation4], %s896_s5 }
 0x1a2   : > { %p1120_p3 = pnand %p1806_p10, %p1805_p1 }
 0x1a4   : > { %1422 = dma.done.wait (!%p1120_p3), %s897_s6, 2048  }
 0x1a5   : > { %1424 = vsyncadd (!%p1120_p3), %s897_s6, 4294965248  ;;  %s19_s14 = sadd.s32 1, %s1447_s14   ;;  %s1807_s9 = smov %s1431_s10 }
 0x1a6   : > { %p16_p6 = scmp.ge.s32.totalorder %s19_s14, 4   ;;  %s1808_s10 = smov %s1435_s11 }
 0x1a7   : > { %s1809_s11 = smov %s1594_s7  ;;  %s1810_s12 = smov %s1443_s13 }
 0x1a8   : > { %s1811_s13 = smov %s1813_s27  ;;  %18 = sbr.rel (!%p16_p6) target bundleno = 7 (0x7), region = 79 }
 0x1af   :  { %902 = vsyncpa [#allocation3], 1 }
 0x1b0   :  { %904 = vsyncpa [#allocation3 + $0x1], 1 }
 0x1b1   :  { %905 = vsyncpa [#allocation6], 1 }
 0x1b2   :  { %907 = vsyncpa [#allocation6 + $0x1], 1 }
 0x1b3   :  { %908 = vsyncpa [#allocation4], 1 }
 0x1b4   :  { %910 = vsyncpa [#allocation4 + $0x1], 1 }

// kernel: _lambda_.6
= control target key start
LH: loop header
LB: loop body
LE: loop exit
PB: predicated region body
PF: predicated region fallthrough
CT: control target
= control target key end

     0   :  { %7 = vsyncpa [#allocation3], 0  ;;  %s1640_s0 = inlined_call_operand.hbm [shape: bf16[32,512], index: 0, kind: input, shape index: {}]   ;;  %s1641_s1 = inlined_call_operand.hbm [shape: bf16[512,512], index: 1, kind: input, shape index: {}]   ;;  %s1642_s2 = inlined_call_operand.hbm [shape: f32[32,512], index: 2, kind: output, shape index: {}]  }
   0x1   :  { %8 = vsyncpa [#allocation6], 0 }
   0x2   :  { %10 = vsyncpa [#allocation6 + $0x1], 0 }
   0x3   :  { %11 = vsyncpa [#allocation4], 0 }
   0x4   :  { %13 = vsyncpa [#allocation4 + $0x1], 0  ;;  %s1350_s9 = smov 0   ;;  %s1352_s10 = smov 0  }
   0x5   :  { %s1354_s11 = smov 0   ;;  %s1356_s12 = smov 0  }
   0x6   :  { %s1358_s13 = smov 0   ;;  %s1360_s14 = smov 0  }
   0x7 LB: > { %s892_s15 = sadd.s32 4294967295, %s1323_s14   ;;  %s893_s16 = sadd.s32 4294967294, %s1323_s14   ;;  %s1323_s14 = sphi %s1360_s14, %s19_s14   ;;  %s1319_s13 = sphi %s1358_s13, %s1668_s13   ;;  %s1315_s12 = sphi %s1356_s12, %s1667_s12   ;;  %s1311_s11 = sphi %s1354_s11, %s1666_s11   ;;  %s1307_s10 = sphi %s1352_s10, %s1665_s10   ;;  %s1303_s9 = sphi %s1350_s9, %s1664_s9  }
   0x8   : > { %p82_p0 = scmp.ne.s32.totalorder %s1311_s11, %s1307_s10  ;;  %p83_p1 = scmp.eq.s32.totalorder %s1323_s14, 0 }
   0x9   : > { %p88_p2 = scmp.ne.s32.totalorder %s1307_s10, %s1303_s9  ;;  %p1387_p3 = scmp.eq.s32.totalorder %s892_s15, 0 }
   0xa   : > { %p1391_p4 = por %p83_p1, %p82_p0  ;;  %p114_p5 = scmp.eq.s32.totalorder %s892_s15, 1 }
   0xb   : > { %s1649_s17 = scalar_select %p1387_p3, 1, 0 }
   0xc   : > { %p1397_p6 = por %p1387_p3, %p88_p2  ;;  %p120_p7 = scmp.eq.s32.totalorder %s893_s16, 1 }
   0xd   : > { %p1401_p8 = por %p114_p5, %p82_p0  ;;  %p894_p9 = scmp.ge.s32.totalorder %s1323_s14, 1 }
   0xe   : > { %s1651_s19 = scalar_select %p1397_p6, 1, 0 }
   0xf   : > { %s1652_s20 = scalar_select %p1401_p8, 1, 0 }
  0x10   : > { %p1406_p10 = por %p120_p7, %p88_p2  ;;  %p127_p11 = scmp.lt.s32.totalorder %s1323_s14, 3 }
  0x11   : > { %s1325_s23 = smov [#allocation2]   ;;  %p1012_p1 = scmp.lt.s32.totalorder %s1323_s14, 2 }
  0x12   : > { %s1653_s21 = scalar_select %p1406_p10, 1, 0 }
  0x13   : > { %p1411_p12 = pnand %p894_p9, %p127_p11  ;;  %s145_s24 = sshll.u32 %s1325_s23, 4  ;;  %s1415_s24 = int_to_ptr.vmem [resolvable:$true] %s145_s24 }
  0x14   : > { %p1429_p2 = pnand %p1012_p1, %p1391_p4  ;;  %s34_s27 = sadd.s32 1, %s1319_s13 }
  0x15   : > { %s1654_s22 = scalar_select %p1411_p12, 1, 0 }
  0x16   : > { %p999_p13 = pneg %p1411_p12  ;;  %s1179_s30 = scalar_lea.hbm %s1640_s0, 1024 }
  0x17   : > { %s1656_s26 = scalar_select %p1429_p2, 1, 0 }
  0x18   : > { %p1423_p5 = pnand %p999_p13, %p1387_p3  ;;  %p1180_p7 = scmp.ne.s32.totalorder %s1640_s0, %s1179_s30 }
  0x19   : > { %p1186_p4 = scmp.lt.u32.totalorder %s1179_s30, %s1640_s0 }
  0x1a   : > { %p1181_p9 = pneg %p1423_p5 }
  0x1c   : > { %p1182_p11 = pnand %p1181_p9, %p1180_p7 }
  0x1e   : > { %p1183_p13 = pneg %p1182_p11 }
  0x20   : > { %p1188_p1 = pnand %p1186_p4, %p1183_p13 }
  0x22   : > { %1191 = shalt.err (!%p1188_p1)
}
  0x23   : > { %s1192_s7 = scalar_lea.vmem %s1415_s24, 1024  ;;  %p1200_p6 = scmp.lt.s32.totalorder %s1415_s24, %s1415_s24 }
  0x24   : > { %p1193_p0 = scmp.ne.s32.totalorder %s1415_s24, %s1192_s7  ;;  %p1201_p3 = scmp.lt.s32.totalorder %s1192_s7, %s1192_s7 }
  0x26   : > { %p1195_p10 = pnand %p1193_p0, %p1181_p9  ;;  %p1202_p12 = por %p1201_p3, %p1200_p6 }
  0x28   : > { %p1196_p8 = pneg %p1195_p10 }
  0x2a   : > { %p1203_p2 = pnand %p1202_p12, %p1196_p8 }
  0x2c   : > { %1206 = shalt.err (!%p1203_p2)
}
  0x2d   : > { %s1326_s8 = smov 256   ;;  %s1327_s15 = smov 16  }
  0x2e   : > { %1002 = dma.hbm_to_vmem [thread:$0]  (!%p1423_p5), %s1640_s0, 1024, %s1415_s24, [#allocation3], %s1326_s8, %s1326_s8, %s1327_s15  }
  0x2f   : > { %p36_p10 = scmp.ge.s32.totalorder %s34_s27, 2  ;;  %s75_s23 = sadd.s32 1, %s1311_s11 }
  0x30   : > { %s159_s28 = sand.u32 1, %s1311_s11   ;;  %s981_s3 = sshll.u32 %s1319_s13, 7 }
  0x31   : > { %s1670_s27 = smov (%p36_p10, %s34_s27), 0  ;;  %s897_s29 = sshll.u32 %s159_s28, 9 }
  0x32   : > { %s71_s30 = ssub.s32 %s1319_s13, %s1670_s27  ;;  %s1467_s5 = scalar_lea.hbm %s1641_s1, %s981_s3 }
  0x33   : > { %p73_p3 = scmp.eq.s32.totalorder %s71_s30, 0  ;;  %s163_s24 = scalar_lea.vmem [#allocation5], %s897_s29 }
  0x34   : > { %s173_s6 = sshll.u32 %s163_s24, 4  ;;  %s1474_s15 = scalar_lea.sflag [#allocation6], %s159_s28  ;;  %s1472_s6 = int_to_ptr.vmem [resolvable:$true] %s173_s6 }
  0x35   : > { %s1470_s7 = scalar_select %p73_p3, %s1311_s11, %s75_s23  }
  0x36   : > { %s1207_s16 = scalar_lea.hbm %s1467_s5, 8192  ;;  %p1657_p8 = scmp.ne.s32.totalorder %s1656_s26, 0 }
  0x37   : > { %p1208_p6 = scmp.ne.s32.totalorder %s1467_s5, %s1207_s16  ;;  %s1212_s3 = scalar_lea.hbm %s1641_s1, 16384 }
  0x38   : > { %p1209_p12 = pneg %p1657_p8  ;;  %p1213_p2 = scmp.lt.u32.totalorder %s1467_s5, %s1641_s1 }
  0x39   : > { %p1214_p7 = scmp.lt.u32.totalorder %s1212_s3, %s1207_s16  ;;  %p1216_p11 = scmp.lt.u32.totalorder %s1207_s16, %s1467_s5 }
  0x3a   : > { %p1210_p0 = pnand %p1209_p12, %p1208_p6 }
  0x3b   : > { %p1215_p9 = por %p1214_p7, %p1213_p2 }
  0x3c   : > { %p1211_p5 = pneg %p1210_p0 }
  0x3d   : > { %p1217_p13 = por %p1216_p11, %p1215_p9 }
  0x3f   : > { %p1218_p4 = pnand %p1217_p13, %p1211_p5 }
  0x41   : > { %1221 = shalt.err (!%p1218_p4)
}
  0x42   : > { %s1222_s23 = scalar_lea.vmem %s1472_s6, 8192  ;;  %s1328_s28 = smov [#allocation5]  }
  0x43   : > { %p1223_p1 = scmp.ne.s32.totalorder %s1472_s6, %s1222_s23  ;;  %s1227_s25 = sshll.u32 %s1328_s28, 4  ;;  %s1228_s25 = int_to_ptr.vmem [resolvable:$false] %s1227_s25 }
  0x44   : > { %s1229_s24 = scalar_lea.vmem %s1228_s25, 16384  ;;  %p1230_p6 = scmp.lt.s32.totalorder %s1472_s6, %s1228_s25 }
  0x45   : > { %p1225_p10 = pnand %p1223_p1, %p1209_p12  ;;  %p1231_p0 = scmp.lt.s32.totalorder %s1229_s24, %s1222_s23 }
  0x47   : > { %p1226_p3 = pneg %p1225_p10  ;;  %p1232_p2 = por %p1231_p0, %p1230_p6 }
  0x49   : > { %p1233_p7 = pnand %p1232_p2, %p1226_p3 }
  0x4b   : > { %1236 = shalt.err (!%p1233_p7)
}
  0x4c   : > { %s1329_s16 = smov 128   ;;  %s1330_s18 = smov 8  }
  0x4d   : > { %1006 = dma.hbm_to_vmem [thread:$0]  (!%p1657_p8), %s1467_s5, 8192, %s1472_s6, %s1474_s15, %s1326_s8, %s1329_s16, %s1330_s18  }
  0x4e   : > { %p1658_p12 = scmp.ne.s32.totalorder %s1654_s22, 0 }
  0x4f   : > { %p1659_p5 = scmp.ne.s32.totalorder (!%p1658_p12), %s1649_s17, 0 }
  0x50   : > { %185 = sbr.rel (%p1658_p12) target bundleno = 399 (0x18f), region = 28 }
  0x57   : > { %1290 = dma.done.wait (%p1659_p5), [#allocation3], 1024  }
  0x58   : > { %1292 = vsyncadd (%p1659_p5), [#allocation3], 4294966272  ;;  %s1510_s30 = sand.u32 1, %s1307_s10   ;;  %p1660_p8 = scmp.ne.s32.totalorder %s1651_s19, 0 }
  0x59   : > { %s902_s3 = sshll.u32 %s1510_s30, 9  ;;  %s192_s29 = scalar_lea.sflag [#allocation6], %s1510_s30 }
  0x5a   : > { %s1514_s26 = scalar_lea.vmem [#allocation5], %s902_s3 }
  0x5b   : > { %1294 = dma.done.wait (%p1660_p8), %s192_s29, 8192  }
  0x5c   : > { %1296 = vsyncadd (%p1660_p8), %s192_s29, 4294959104  ;;  %v1071_v0 = vld [vmem:[%s1514_s26 + $0x4] ss:$8 sps:$4 sm:$0xff]   ;;  %v1075_v2 = vld [vmem:[%s1514_s26] ss:$8 sps:$4 sm:$0xff]   ;;  %s903_s17 = sshll.u32 %s1510_s30, 6 }
  0x5d   : > { %v1073_v1 = vld [vmem:[%s1514_s26 + $0x104] ss:$8 sps:$4 sm:$0xff]   ;;  %654 = vmatprep.subr.bf16.mxu1 %v1071_v0  ;;  %v1076_v3 = vld [vmem:[%s1514_s26 + $0x100] ss:$8 sps:$4 sm:$0xff]   ;;  %v1077_v4 = vld [vmem:[%s1514_s26 + $0x14] ss:$8 sps:$4 sm:$0xff]  }
  0x5e   : > { %707 = vmatprep.subr.bf16.mxu0 %v1073_v1  ;;  %655 = vmatpush1.bf16.msra.mxu1 %v1075_v2  ;;  %v1079_v5 = vld [vmem:[%s1514_s26 + $0x114] ss:$8 sps:$4 sm:$0xff]   ;;  %v1081_v6 = vld [vmem:[%s1514_s26 + $0x10] ss:$8 sps:$4 sm:$0xff]   ;;  %v1083_v8 = vld [vmem:[%s1514_s26 + $0x24] ss:$8 sps:$4 sm:$0xff]  }
  0x5f   : > { %708 = vmatpush1.bf16.msra.mxu0 %v1076_v3  ;;  %656 = vmatprep.subr.bf16.mxu1 %v1077_v4  ;;  %v1082_v7 = vld [vmem:[%s1514_s26 + $0x110] ss:$8 sps:$4 sm:$0xff]   ;;  %v1085_v9 = vld [vmem:[%s1514_s26 + $0x124] ss:$8 sps:$4 sm:$0xff]   ;;  %v1087_v10 = vld [vmem:[%s1514_s26 + $0x20] ss:$8 sps:$4 sm:$0xff]  }
  0x60   : > { %709 = vmatprep.subr.bf16.mxu0 %v1079_v5  ;;  %v1088_v11 = vld [vmem:[%s1514_s26 + $0x120] ss:$8 sps:$4 sm:$0xff]   ;;  %v1089_v12 = vld [vmem:[%s1514_s26 + $0x34] ss:$8 sps:$4 sm:$0xff]   ;;  %v1093_v14 = vld [vmem:[%s1514_s26 + $0x30] ss:$8 sps:$4 sm:$0xff]  }
  0x61   : > { %v1091_v13 = vld [vmem:[%s1514_s26 + $0x134] ss:$8 sps:$4 sm:$0xff]   ;;  %v1094_v15 = vld [vmem:[%s1514_s26 + $0x130] ss:$8 sps:$4 sm:$0xff]   ;;  %v1095_v16 = vld [vmem:[%s1514_s26 + $0x44] ss:$8 sps:$4 sm:$0xff]  }
  0x62   : > { %657 = vmatpush1.bf16.msra.mxu1 %v1081_v6  ;;  %v1097_v17 = vld [vmem:[%s1514_s26 + $0x144] ss:$8 sps:$4 sm:$0xff]   ;;  %v1099_v18 = vld [vmem:[%s1514_s26 + $0x40] ss:$8 sps:$4 sm:$0xff]   ;;  %v1101_v20 = vld [vmem:[%s1514_s26 + $0x54] ss:$8 sps:$4 sm:$0xff]  }
  0x63   : > { %710 = vmatpush1.bf16.msra.mxu0 %v1082_v7  ;;  %658 = vmatprep.subr.bf16.mxu1 %v1083_v8  ;;  %v1100_v19 = vld [vmem:[%s1514_s26 + $0x140] ss:$8 sps:$4 sm:$0xff]   ;;  %v1103_v21 = vld [vmem:[%s1514_s26 + $0x154] ss:$8 sps:$4 sm:$0xff]   ;;  %v1105_v22 = vld [vmem:[%s1514_s26 + $0x50] ss:$8 sps:$4 sm:$0xff]  }
  0x64   : > { %711 = vmatprep.subr.bf16.mxu0 %v1085_v9  ;;  %v1106_v23 = vld [vmem:[%s1514_s26 + $0x150] ss:$8 sps:$4 sm:$0xff]   ;;  %v1107_v24 = vld [vmem:[%s1514_s26 + $0x64] ss:$8 sps:$4 sm:$0xff]   ;;  %v1111_v26 = vld [vmem:[%s1514_s26 + $0x60] ss:$8 sps:$4 sm:$0xff]  }
  0x65   : > { %v1109_v25 = vld [vmem:[%s1514_s26 + $0x164] ss:$8 sps:$4 sm:$0xff]   ;;  %v1112_v27 = vld [vmem:[%s1514_s26 + $0x160] ss:$8 sps:$4 sm:$0xff]   ;;  %v1113_v28 = vld [vmem:[%s1514_s26 + $0x74] ss:$8 sps:$4 sm:$0xff]  }
  0x66   : > { %659 = vmatpush1.bf16.msra.mxu1 %v1087_v10  ;;  %v1115_v29 = vld [vmem:[%s1514_s26 + $0x174] ss:$8 sps:$4 sm:$0xff]   ;;  %v1117_v30 = vld [vmem:[%s1514_s26 + $0x70] ss:$8 sps:$4 sm:$0xff]   ;;  %v1119_v32 = vld [vmem:[%s1514_s26 + $0x84] ss:$8 sps:$4 sm:$0xff]  }
  0x67   : > { %712 = vmatpush1.bf16.msra.mxu0 %v1088_v11  ;;  %660 = vmatprep.subr.bf16.mxu1 %v1089_v12  ;;  %v1118_v31 = vld [vmem:[%s1514_s26 + $0x170] ss:$8 sps:$4 sm:$0xff]   ;;  %v1121_v33 = vld [vmem:[%s1514_s26 + $0x184] ss:$8 sps:$4 sm:$0xff]   ;;  %v1123_v34 = vld [vmem:[%s1514_s26 + $0x80] ss:$8 sps:$4 sm:$0xff]  }
  0x68   : > { %713 = vmatprep.subr.bf16.mxu0 %v1091_v13  ;;  %v1124_v35 = vld [vmem:[%s1514_s26 + $0x180] ss:$8 sps:$4 sm:$0xff]   ;;  %v1125_v36 = vld [vmem:[%s1514_s26 + $0x94] ss:$8 sps:$4 sm:$0xff]   ;;  %v1129_v38 = vld [vmem:[%s1514_s26 + $0x90] ss:$8 sps:$4 sm:$0xff]  }
  0x69   : > { %v1127_v37 = vld [vmem:[%s1514_s26 + $0x194] ss:$8 sps:$4 sm:$0xff]   ;;  %v1130_v39 = vld [vmem:[%s1514_s26 + $0x190] ss:$8 sps:$4 sm:$0xff]   ;;  %v1131_v40 = vld [vmem:[%s1514_s26 + $0xa4] ss:$8 sps:$4 sm:$0xff]  }
  0x6a   : > { %661 = vmatpush1.bf16.msra.mxu1 %v1093_v14  ;;  %v1133_v41 = vld [vmem:[%s1514_s26 + $0x1a4] ss:$8 sps:$4 sm:$0xff]   ;;  %v1135_v42 = vld [vmem:[%s1514_s26 + $0xa0] ss:$8 sps:$4 sm:$0xff]   ;;  %v1137_v44 = vld [vmem:[%s1514_s26 + $0xb4] ss:$8 sps:$4 sm:$0xff]  }
  0x6b   : > { %714 = vmatpush1.bf16.msra.mxu0 %v1094_v15  ;;  %662 = vmatprep.subr.bf16.mxu1 %v1095_v16  ;;  %v1136_v43 = vld [vmem:[%s1514_s26 + $0x1a0] ss:$8 sps:$4 sm:$0xff]   ;;  %v1139_v45 = vld [vmem:[%s1514_s26 + $0x1b4] ss:$8 sps:$4 sm:$0xff]   ;;  %v1141_v46 = vld [vmem:[%s1514_s26 + $0xb0] ss:$8 sps:$4 sm:$0xff]  }
  0x6c   : > { %715 = vmatprep.subr.bf16.mxu0 %v1097_v17  ;;  %v1142_v47 = vld [vmem:[%s1514_s26 + $0x1b0] ss:$8 sps:$4 sm:$0xff]   ;;  %v1143_v48 = vld [vmem:[%s1514_s26 + $0xc4] ss:$8 sps:$4 sm:$0xff]   ;;  %v1147_v52 = vld [vmem:[%s1514_s26 + $0xc0] ss:$8 sps:$4 sm:$0xff]  }
  0x6d   : > { %v1169_v49 = vld [vmem:[#allocation2 + $0x4] ss:$16 sps:$4 sm:$0xff]   ;;  %v1172_v51 = vld [vmem:[#allocation2 + $0xc] ss:$16 sps:$4 sm:$0xff]   ;;  %v1148_v53 = vld [vmem:[%s1514_s26 + $0x1c0] ss:$8 sps:$4 sm:$0xff]  }
  0x6e   : > { %663 = vmatpush1.bf16.msra.mxu1 %v1099_v18  ;;  %v1145_v50 = vld [vmem:[%s1514_s26 + $0x1c4] ss:$8 sps:$4 sm:$0xff]   ;;  %686 = vmatprep.mubr.bf16.mxu1 %v1169_v49  ;;  %v1149_v54 = vld [vmem:[%s1514_s26 + $0xd4] ss:$8 sps:$4 sm:$0xff]   ;;  %v1153_v56 = vld [vmem:[%s1514_s26 + $0xd0] ss:$8 sps:$4 sm:$0xff]  }
  0x6f   : > { %716 = vmatpush1.bf16.msra.mxu0 %v1100_v19  ;;  %664 = vmatprep.subr.bf16.mxu1 %v1101_v20  ;;  %v1151_v55 = vld [vmem:[%s1514_s26 + $0x1d4] ss:$8 sps:$4 sm:$0xff]   ;;  %v1154_v57 = vld [vmem:[%s1514_s26 + $0x1d0] ss:$8 sps:$4 sm:$0xff]   ;;  %v1155_v58 = vld [vmem:[%s1514_s26 + $0xe4] ss:$8 sps:$4 sm:$0xff]  }
  0x70   : > { %717 = vmatprep.subr.bf16.mxu0 %v1103_v21  ;;  %739 = vmatprep.mubr.bf16.mxu0 %v1172_v51  ;;  %v1157_v59 = vld [vmem:[%s1514_s26 + $0x1e4] ss:$8 sps:$4 sm:$0xff]   ;;  %v1159_v60 = vld [vmem:[%s1514_s26 + $0xe0] ss:$8 sps:$4 sm:$0xff]   ;;  %v1161_v62 = vld [vmem:[%s1514_s26 + $0xf4] ss:$8 sps:$4 sm:$0xff]  }
  0x71   : > { %v1160_v61 = vld [vmem:[%s1514_s26 + $0x1e0] ss:$8 sps:$4 sm:$0xff]   ;;  %v1163_v63 = vld [vmem:[%s1514_s26 + $0x1f4] ss:$8 sps:$4 sm:$0xff]   ;;  %v1165_v0 = vld [vmem:[%s1514_s26 + $0xf0] ss:$8 sps:$4 sm:$0xff]  }
  0x72   : > { %665 = vmatpush1.bf16.msra.mxu1 %v1105_v22  ;;  %v1166_v1 = vld [vmem:[%s1514_s26 + $0x1f0] ss:$8 sps:$4 sm:$0xff]   ;;  %v1173_v4 = vld [vmem:[#allocation2 + $0x24] ss:$16 sps:$4 sm:$0xff]   ;;  %v1175_v5 = vld [vmem:[#allocation2 + $0x2c] ss:$16 sps:$4 sm:$0xff]  }
  0x73   : > { %718 = vmatpush1.bf16.msra.mxu0 %v1106_v23  ;;  %666 = vmatprep.subr.bf16.mxu1 %v1107_v24  ;;  %v1167_v2 = vld [vmem:[#allocation2] ss:$16 sps:$4 sm:$0xff]   ;;  %v1170_v3 = vld [vmem:[#allocation2 + $0x8] ss:$16 sps:$4 sm:$0xff]   ;;  %s215_s19 = scalar_lea.vmem [#allocation7], %s903_s17  ;;  %s982_s8 = sshll.u32 %s1315_s12, 8 }
  0x74   : > { %719 = vmatprep.subr.bf16.mxu0 %v1109_v25  ;;  %v1177_v6 = vld [vmem:[#allocation2 + $0x20] ss:$16 sps:$4 sm:$0xff]   ;;  %v1178_v7 = vld [vmem:[#allocation2 + $0x28] ss:$16 sps:$4 sm:$0xff]   ;;  %s785_s22 = sshll.u32 %s215_s19, 4  ;;  %s1591_s12 = scalar_lea.hbm %s1642_s2, %s982_s8  ;;  %s1586_s22 = int_to_ptr.vmem [resolvable:$true] %s785_s22 }
  0x75   : > { %s769_s15 = scalar_lea.sflag [#allocation4], %s1510_s30  ;;  %s1237_s4 = scalar_lea.vmem %s1586_s22, 1024 }
  0x76   : > { %667 = vmatpush1.bf16.msra.mxu1 %v1111_v26  ;;  %p1238_p9 = scmp.ne.s32.totalorder %s1586_s22, %s1237_s4  ;;  %p1661_p11 = scmp.ne.s32.totalorder %s1652_s20, 0 }
  0x77   : > { %720 = vmatpush1.bf16.msra.mxu0 %v1112_v27  ;;  %668 = vmatprep.subr.bf16.mxu1 %v1113_v28  ;;  %s1331_s23 = smov [#allocation7]  }
  0x78   : > { %721 = vmatprep.subr.bf16.mxu0 %v1115_v29  ;;  %p1239_p13 = pnand %p1238_p9, %p1661_p11  ;;  %s1241_s28 = sshll.u32 %s1331_s23, 4  ;;  %s1242_s28 = int_to_ptr.vmem [resolvable:$false] %s1241_s28 }
  0x79   : > { %s1243_s25 = scalar_lea.vmem %s1242_s28, 2048  ;;  %p1244_p1 = scmp.lt.s32.totalorder %s1586_s22, %s1242_s28 }
  0x7a   : > { %669 = vmatpush1.bf16.msra.mxu1 %v1117_v30  ;;  %p1240_p4 = pneg %p1239_p13  ;;  %p1245_p10 = scmp.lt.s32.totalorder %s1243_s25, %s1237_s4 }
  0x7b   : > { %722 = vmatpush1.bf16.msra.mxu0 %v1118_v31  ;;  %670 = vmatprep.subr.bf16.mxu1 %v1119_v32 }
  0x7c   : > { %723 = vmatprep.subr.bf16.mxu0 %v1121_v33  ;;  %p1246_p3 = por %p1245_p10, %p1244_p1 }
  0x7e   : > { %671 = vmatpush1.bf16.msra.mxu1 %v1123_v34  ;;  %p1247_p6 = pnand %p1246_p3, %p1240_p4 }
  0x7f   : > { %724 = vmatpush1.bf16.msra.mxu0 %v1124_v35  ;;  %672 = vmatprep.subr.bf16.mxu1 %v1125_v36 }
  0x80   : > { %725 = vmatprep.subr.bf16.mxu0 %v1127_v37 }
  0x82   : > { %673 = vmatpush1.bf16.msra.mxu1 %v1129_v38 }
  0x83   : > { %726 = vmatpush1.bf16.msra.mxu0 %v1130_v39  ;;  %674 = vmatprep.subr.bf16.mxu1 %v1131_v40 }
  0x84   : > { %727 = vmatprep.subr.bf16.mxu0 %v1133_v41 }
  0x86   : > { %675 = vmatpush1.bf16.msra.mxu1 %v1135_v42 }
  0x87   : > { %728 = vmatpush1.bf16.msra.mxu0 %v1136_v43  ;;  %676 = vmatprep.subr.bf16.mxu1 %v1137_v44 }
  0x88   : > { %729 = vmatprep.subr.bf16.mxu0 %v1139_v45 }
  0x8a   : > { %677 = vmatpush1.bf16.msra.mxu1 %v1141_v46 }
  0x8b   : > { %730 = vmatpush1.bf16.msra.mxu0 %v1142_v47  ;;  %678 = vmatprep.subr.bf16.mxu1 %v1143_v48 }
  0x8c   : > { %731 = vmatprep.subr.bf16.mxu0 %v1145_v50 }
  0x8e   : > { %679 = vmatpush1.bf16.msra.mxu1 %v1147_v52 }
  0x8f   : > { %732 = vmatpush1.bf16.msra.mxu0 %v1148_v53  ;;  %680 = vmatprep.subr.bf16.mxu1 %v1149_v54 }
  0x90   : > { %733 = vmatprep.subr.bf16.mxu0 %v1151_v55 }
  0x92   : > { %681 = vmatpush1.bf16.msra.mxu1 %v1153_v56 }
  0x93   : > { %734 = vmatpush1.bf16.msra.mxu0 %v1154_v57  ;;  %682 = vmatprep.subr.bf16.mxu1 %v1155_v58 }
  0x94   : > { %735 = vmatprep.subr.bf16.mxu0 %v1157_v59 }
  0x96   : > { %683 = vmatpush1.bf16.msra.mxu1 %v1159_v60 }
  0x97   : > { %736 = vmatpush1.bf16.msra.mxu0 %v1160_v61  ;;  %684 = vmatprep.subr.bf16.mxu1 %v1161_v62 }
  0x98   : > { %737 = vmatprep.subr.bf16.mxu0 %v1163_v63 }
  0x9a   : > { %685 = vmatpush1.bf16.msra.mxu1 %v1165_v0 }
  0x9b   : > { %738 = vmatpush1.bf16.msra.mxu0 %v1166_v1 }
  0x9d   : > { %687 = vmatmul.mubr.bf16.vlgmr.msra.gmra.mrb[0].mxu1 %v1167_v2 }
  0x9e   : > { %740 = vmatmul.mubr.bf16.vlgmr.msra.gmra.mrb[0].mxu0 %v1170_v3  ;;  %696 = vmatprep.mubr.bf16.mxu1 %v1173_v4 }
  0x9f   : > { %749 = vmatprep.mubr.bf16.mxu0 %v1175_v5 }
  0xa5   : > { %697 = vmatmul.mubr.bf16.gmra.mrb[4].mxu1 %v1177_v6 }
  0xa6   : > { %750 = vmatmul.mubr.bf16.gmra.mrb[4].mxu0 %v1178_v7 }
 0x170   : > { %v688_v8 = vpop.f32.mrb[0].mxu1 }
 0x171   : > { %v741_v9 = vpop.f32.mrb[0].mxu0  ;;  %v690_v11 = vpop.f32.mrb[1].mxu1 }
 0x172   : > { %v742_v10 = vadd.f32 %v741_v9, %v688_v8  ;;  %v743_v12 = vpop.f32.mrb[1].mxu0  ;;  %v692_v14 = vpop.f32.mrb[2].mxu1 }
 0x173   : > { %v744_v13 = vadd.f32 %v743_v12, %v690_v11  ;;  %v745_v15 = vpop.f32.mrb[2].mxu0  ;;  %v694_v17 = vpop.f32.mrb[3].mxu1 }
 0x174   : > { %760 = vst [vmem:[%s215_s19] sm:$0xff] %v742_v10  ;;  %v746_v16 = vadd.f32 %v745_v15, %v692_v14  ;;  %v747_v18 = vpop.f32.mrb[3].mxu0 }
 0x175   : > { %761 = vst [vmem:[%s215_s19 + $0x8] sm:$0xff] %v744_v13  ;;  %v748_v19 = vadd.f32 %v747_v18, %v694_v17 }
 0x176   : > { %762 = vst [vmem:[%s215_s19 + $0x10] sm:$0xff] %v746_v16 }
 0x177   : > { %763 = vst [vmem:[%s215_s19 + $0x18] sm:$0xff] %v748_v19 }
 0x178   : > { %v698_v20 = vpop.f32.mrb[4].mxu1 }
 0x179   : > { %v751_v21 = vpop.f32.mrb[4].mxu0  ;;  %v700_v23 = vpop.f32.mrb[5].mxu1 }
 0x17a   : > { %v752_v22 = vadd.f32 %v751_v21, %v698_v20  ;;  %v753_v24 = vpop.f32.mrb[5].mxu0  ;;  %v702_v26 = vpop.f32.mrb[6].mxu1 }
 0x17b   : > { %v754_v25 = vadd.f32 %v753_v24, %v700_v23  ;;  %v755_v27 = vpop.f32.mrb[6].mxu0  ;;  %v704_v29 = vpop.f32.mrb[7].mxu1 }
 0x17c   : > { %764 = vst [vmem:[%s215_s19 + $0x20] sm:$0xff] %v752_v22  ;;  %v756_v28 = vadd.f32 %v755_v27, %v702_v26  ;;  %v757_v30 = vpop.f32.mrb[7].mxu0 }
 0x17d   : > { %765 = vst [vmem:[%s215_s19 + $0x28] sm:$0xff] %v754_v25  ;;  %v758_v31 = vadd.f32 %v757_v30, %v704_v29 }
 0x17e   : > { %766 = vst [vmem:[%s215_s19 + $0x30] sm:$0xff] %v756_v28 }
 0x17f   : > { %767 = vst [vmem:[%s215_s19 + $0x38] sm:$0xff] %v758_v31 }
 0x180   : > { %1250 = shalt.err (!%p1247_p6)
}
 0x181   : > { %s1251_s24 = scalar_lea.hbm %s1591_s12, 1024  ;;  %s1255_s3 = scalar_lea.hbm %s1642_s2, 2048 }
 0x182   : > { %p1252_p0 = scmp.ne.s32.totalorder %s1591_s12, %s1251_s24  ;;  %p1256_p12 = scmp.lt.u32.totalorder %s1591_s12, %s1642_s2 }
 0x183   : > { %p1257_p5 = scmp.lt.u32.totalorder %s1255_s3, %s1251_s24  ;;  %p1259_p9 = scmp.lt.u32.totalorder %s1251_s24, %s1591_s12 }
 0x184   : > { %p1253_p2 = pnand %p1252_p0, %p1661_p11 }
 0x185   : > { %p1258_p8 = por %p1257_p5, %p1256_p12 }
 0x186   : > { %p1254_p7 = pneg %p1253_p2 }
 0x187   : > { %p1260_p13 = por %p1259_p9, %p1258_p8 }
 0x189   : > { %p1261_p4 = pnand %p1260_p13, %p1254_p7 }
 0x18b   : > { %1264 = shalt.err (!%p1261_p4)
}
 0x18c   : > { %s1332_s17 = smov 256   ;;  %s1333_s19 = smov 512  }
 0x18d   : > { %s1334_s8 = smov 16  }
 0x18e   : > { %997 = dma.vmem_to_hbm [thread:$0]  (%p1661_p11), %s1586_s22, 1024, %s1591_s12, %s769_s15, %s1332_s17, %s1333_s19, %s1334_s8  }
 0x18f PF: > { %s800_s5 = sand.u32 1, %s1303_s9   ;;  %p1662_p1 = scmp.ne.s32.totalorder %s1653_s21, 0 }
 0x190   : > { %p1663_p10 = scmp.ge.s32.totalorder %s1323_s14, 2  ;;  %s801_s6 = scalar_lea.sflag [#allocation4], %s800_s5 }
 0x192   : > { %p1008_p3 = pnand %p1663_p10, %p1662_p1 }
 0x194   : > { %1298 = dma.done.wait (!%p1008_p3), %s801_s6, 1024  }
 0x195   : > { %1300 = vsyncadd (!%p1008_p3), %s801_s6, 4294966272  ;;  %s19_s14 = sadd.s32 1, %s1323_s14   ;;  %s1664_s9 = smov %s1307_s10 }
 0x196   : > { %p16_p6 = scmp.ge.s32.totalorder %s19_s14, 4   ;;  %s1665_s10 = smov %s1311_s11 }
 0x197   : > { %s1666_s11 = smov %s1470_s7  ;;  %s1667_s12 = smov %s1319_s13 }
 0x198   : > { %s1668_s13 = smov %s1670_s27  ;;  %18 = sbr.rel (!%p16_p6) target bundleno = 7 (0x7), region = 79 }
 0x19f   :  { %806 = vsyncpa [#allocation3], 1 }
 0x1a0   :  { %808 = vsyncpa [#allocation3 + $0x1], 1 }
 0x1a1   :  { %809 = vsyncpa [#allocation6], 1 }
 0x1a2   :  { %811 = vsyncpa [#allocation6 + $0x1], 1 }
 0x1a3   :  { %812 = vsyncpa [#allocation4], 1 }
 0x1a4   :  { %814 = vsyncpa [#allocation4 + $0x1], 1 }

// kernel: _lambda_.7
= control target key start
LH: loop header
LB: loop body
LE: loop exit
PB: predicated region body
PF: predicated region fallthrough
CT: control target
= control target key end

     0   :  { %7 = vsyncpa [#allocation3], 0  ;;  %s682_s0 = inlined_call_operand.hbm [shape: bf16[16,512], index: 0, kind: input, shape index: {}]   ;;  %s683_s1 = inlined_call_operand.hbm [shape: bf16[512,128], index: 1, kind: input, shape index: {}]   ;;  %s684_s2 = inlined_call_operand.hbm [shape: f32[16,128], index: 2, kind: output, shape index: {}]  }
   0x1   :  { %8 = vsyncpa [#allocation6], 0 }
   0x2   :  { %9 = vsyncpa [#allocation4], 0  ;;  %s622_s9 = smov [#allocation2]   ;;  %s550_s13 = scalar_lea.hbm %s682_s0, 512 }
   0x3   :  { %s15_s10 = sshll.u32 %s622_s9, 4  ;;  %p551_p0 = scmp.ne.s32.totalorder %s682_s0, %s550_s13  ;;  %s16_s10 = int_to_ptr.vmem [resolvable:$true] %s15_s10 }
   0x4   :  { %p554_p1 = scmp.lt.u32.totalorder %s550_s13, %s682_s0 }
   0x6   :  { %p556_p2 = pnand %p554_p1, %p551_p0 }
   0x8   :  { %559 = shalt.err (!%p556_p2)
}
   0x9   :  { %s560_s18 = scalar_lea.vmem %s16_s10, 512  ;;  %p565_p4 = scmp.lt.s32.totalorder %s16_s10, %s16_s10 }
   0xa   :  { %p561_p3 = scmp.ne.s32.totalorder %s16_s10, %s560_s18  ;;  %p566_p5 = scmp.lt.s32.totalorder %s560_s18, %s560_s18 }
   0xc   :  { %p567_p6 = por %p566_p5, %p565_p4 }
   0xe   :  { %p568_p7 = pnand %p567_p6, %p561_p3 }
  0x10   :  { %571 = shalt.err (!%p568_p7)
}
  0x11   :  { %s623_s19 = smov 256   ;;  %s624_s20 = smov 16  }
  0x12   :  { %21 = dma.hbm_to_vmem [thread:$0]  %s682_s0, 512, %s16_s10, [#allocation3], %s623_s19, %s623_s19, %s624_s20  }
  0x13   :  { %s625_s23 = smov [#allocation5]   ;;  %s572_s27 = scalar_lea.hbm %s683_s1, 4096 }
  0x14   :  { %s27_s24 = sshll.u32 %s625_s23, 4  ;;  %p573_p8 = scmp.ne.s32.totalorder %s683_s1, %s572_s27  ;;  %s28_s24 = int_to_ptr.vmem [resolvable:$true] %s27_s24 }
  0x15   :  { %p576_p9 = scmp.lt.u32.totalorder %s572_s27, %s683_s1 }
  0x17   :  { %p578_p10 = pnand %p576_p9, %p573_p8 }
  0x19   :  { %581 = shalt.err (!%p578_p10)
}
  0x1a   :  { %s582_s4 = scalar_lea.vmem %s28_s24, 4096  ;;  %p587_p12 = scmp.lt.s32.totalorder %s28_s24, %s28_s24 }
  0x1b   :  { %p583_p11 = scmp.ne.s32.totalorder %s28_s24, %s582_s4  ;;  %p588_p13 = scmp.lt.s32.totalorder %s582_s4, %s582_s4 }
  0x1d   :  { %p589_p0 = por %p588_p13, %p587_p12 }
  0x1f   :  { %p590_p1 = pnand %p589_p0, %p583_p11 }
  0x21   :  { %593 = shalt.err (!%p590_p1)
}
  0x22   :  { %s626_s0 = smov 64   ;;  %s627_s5 = smov 4  }
  0x23   :  { %33 = dma.hbm_to_vmem [thread:$0]  %s683_s1, 4096, %s28_s24, [#allocation6], %s626_s0, %s626_s0, %s627_s5  }
  0x24   :  { %616 = dma.done.wait [#allocation3], 512  }
  0x25   :  { %617 = vsyncadd [#allocation3], 4294966784 }
  0x26   :  { %618 = dma.done.wait [#allocation6], 4096  }
  0x27   :  { %619 = vsyncadd [#allocation6], 4294963200  ;;  %v512_v0 = vld [vmem:[#allocation5 + $0x40] sm:$0xff]   ;;  %v516_v4 = vld [vmem:[#allocation5 + $0x48] sm:$0xff]   ;;  %s628_s1 = smov [#allocation7]  }
  0x28   :  { %v513_v1 = vld [vmem:[#allocation5 + $0xc0] sm:$0xff]   ;;  %459 = vmatprep.subr.bf16.mxu0 %v512_v0  ;;  %v517_v5 = vld [vmem:[#allocation5 + $0xc8] sm:$0xff]   ;;  %v520_v8 = vld [vmem:[#allocation5 + $0x50] sm:$0xff]   ;;  %s410_s8 = sshll.u32 %s628_s1, 4  ;;  %s411_s8 = int_to_ptr.vmem [resolvable:$true] %s410_s8 }
  0x29   :  { %v514_v2 = vld [vmem:[#allocation5] sm:$0xff]   ;;  %481 = vmatprep.subr.bf16.mxu1 %v513_v1  ;;  %v518_v6 = vld [vmem:[#allocation5 + $0x8] sm:$0xff]   ;;  %v521_v9 = vld [vmem:[#allocation5 + $0xd0] sm:$0xff]   ;;  %s594_s9 = scalar_lea.vmem %s411_s8, 256  ;;  %p599_p3 = scmp.lt.s32.totalorder %s411_s8, %s411_s8 }
  0x2a   :  { %v515_v3 = vld [vmem:[#allocation5 + $0x80] sm:$0xff]   ;;  %460 = vmatpush3.bf16.msra.mxu0 %v514_v2  ;;  %v519_v7 = vld [vmem:[#allocation5 + $0x88] sm:$0xff]   ;;  %v522_v10 = vld [vmem:[#allocation5 + $0x10] sm:$0xff]   ;;  %p595_p2 = scmp.ne.s32.totalorder %s411_s8, %s594_s9  ;;  %p600_p4 = scmp.lt.s32.totalorder %s594_s9, %s594_s9 }
  0x2b   :  { %482 = vmatpush3.bf16.msra.mxu1 %v515_v3  ;;  %461 = vmatprep.subr.bf16.mxu0 %v516_v4  ;;  %v523_v11 = vld [vmem:[#allocation5 + $0x90] sm:$0xff]   ;;  %v524_v12 = vld [vmem:[#allocation5 + $0x58] sm:$0xff]   ;;  %v528_v16 = vld [vmem:[#allocation5 + $0x60] sm:$0xff]  }
  0x2c   :  { %483 = vmatprep.subr.bf16.mxu1 %v517_v5  ;;  %v525_v13 = vld [vmem:[#allocation5 + $0xd8] sm:$0xff]   ;;  %v529_v17 = vld [vmem:[#allocation5 + $0xe0] sm:$0xff]   ;;  %v532_v20 = vld [vmem:[#allocation5 + $0x68] sm:$0xff]   ;;  %p601_p5 = por %p600_p4, %p599_p3 }
  0x2d   :  { %v526_v14 = vld [vmem:[#allocation5 + $0x18] sm:$0xff]   ;;  %v530_v18 = vld [vmem:[#allocation5 + $0x20] sm:$0xff]   ;;  %v533_v21 = vld [vmem:[#allocation5 + $0xe8] sm:$0xff]  }
  0x2e   :  { %462 = vmatpush3.bf16.msra.mxu0 %v518_v6  ;;  %v527_v15 = vld [vmem:[#allocation5 + $0x98] sm:$0xff]   ;;  %v531_v19 = vld [vmem:[#allocation5 + $0xa0] sm:$0xff]   ;;  %v534_v22 = vld [vmem:[#allocation5 + $0x28] sm:$0xff]   ;;  %p602_p6 = pnand %p601_p5, %p595_p2 }
  0x2f   :  { %484 = vmatpush3.bf16.msra.mxu1 %v519_v7  ;;  %463 = vmatprep.subr.bf16.mxu0 %v520_v8  ;;  %v535_v23 = vld [vmem:[#allocation5 + $0xa8] sm:$0xff]   ;;  %v536_v24 = vld [vmem:[#allocation5 + $0x70] sm:$0xff]   ;;  %v540_v28 = vld [vmem:[#allocation5 + $0x78] sm:$0xff]  }
  0x30   :  { %485 = vmatprep.subr.bf16.mxu1 %v521_v9  ;;  %v537_v25 = vld [vmem:[#allocation5 + $0xf0] sm:$0xff]   ;;  %v541_v29 = vld [vmem:[#allocation5 + $0xf8] sm:$0xff]  }
  0x31   :  { %v538_v26 = vld [vmem:[#allocation5 + $0x30] sm:$0xff]   ;;  %v542_v30 = vld [vmem:[#allocation5 + $0x38] sm:$0xff]  }
  0x32   :  { %464 = vmatpush3.bf16.msra.mxu0 %v522_v10  ;;  %v539_v27 = vld [vmem:[#allocation5 + $0xb0] sm:$0xff]   ;;  %v543_v31 = vld [vmem:[#allocation5 + $0xb8] sm:$0xff]  }
  0x33   :  { %486 = vmatpush3.bf16.msra.mxu1 %v523_v11  ;;  %465 = vmatprep.subr.bf16.mxu0 %v524_v12  ;;  %v544_v32 = vld [vmem:[#allocation2] ss:$16 sps:$4 sm:$0xff]   ;;  %v546_v33 = vld [vmem:[#allocation2 + $0x4] ss:$16 sps:$4 sm:$0xff]   ;;  %v547_v34 = vld [vmem:[#allocation2 + $0x8] ss:$16 sps:$4 sm:$0xff]  }
  0x34   :  { %487 = vmatprep.subr.bf16.mxu1 %v525_v13  ;;  %v549_v35 = vld [vmem:[#allocation2 + $0xc] ss:$16 sps:$4 sm:$0xff]   ;;  %353 = vmatprep.mubr.bf16.mxu0 %v546_v33 }
  0x35   :  { %394 = vmatprep.mubr.bf16.mxu1 %v549_v35 }
  0x36   :  { %466 = vmatpush3.bf16.msra.mxu0 %v526_v14 }
  0x37   :  { %488 = vmatpush3.bf16.msra.mxu1 %v527_v15  ;;  %467 = vmatprep.subr.bf16.mxu0 %v528_v16 }
  0x38   :  { %489 = vmatprep.subr.bf16.mxu1 %v529_v17 }
  0x3a   :  { %468 = vmatpush3.bf16.msra.mxu0 %v530_v18 }
  0x3b   :  { %490 = vmatpush3.bf16.msra.mxu1 %v531_v19  ;;  %469 = vmatprep.subr.bf16.mxu0 %v532_v20 }
  0x3c   :  { %491 = vmatprep.subr.bf16.mxu1 %v533_v21 }
  0x3e   :  { %470 = vmatpush3.bf16.msra.mxu0 %v534_v22 }
  0x3f   :  { %492 = vmatpush3.bf16.msra.mxu1 %v535_v23  ;;  %471 = vmatprep.subr.bf16.mxu0 %v536_v24 }
  0x40   :  { %493 = vmatprep.subr.bf16.mxu1 %v537_v25 }
  0x42   :  { %472 = vmatpush3.bf16.msra.mxu0 %v538_v26 }
  0x43   :  { %494 = vmatpush3.bf16.msra.mxu1 %v539_v27  ;;  %473 = vmatprep.subr.bf16.mxu0 %v540_v28 }
  0x44   :  { %495 = vmatprep.subr.bf16.mxu1 %v541_v29 }
  0x46   :  { %474 = vmatpush3.bf16.msra.mxu0 %v542_v30 }
  0x47   :  { %496 = vmatpush3.bf16.msra.mxu1 %v543_v31 }
  0x49   :  { %354 = vmatmul.mubr.bf16.vlgmr.msra.gmra.mrb[0].mxu0 %v544_v32 }
  0x4a   :  { %395 = vmatmul.mubr.bf16.vlgmr.msra.gmra.mrb[0].mxu1 %v547_v34 }
 0x11c   :  { %v475_v36 = vpop.f32.mrb[0].mxu0 }
 0x11d   :  { %v497_v37 = vpop.f32.mrb[0].mxu1  ;;  %v476_v38 = vpop.f32.mrb[1].mxu0 }
 0x11e   :  { %v477_v39 = vadd.f32 %v476_v38, %v475_v36  ;;  %v498_v40 = vpop.f32.mrb[1].mxu1  ;;  %v478_v41 = vpop.f32.mrb[2].mxu0 }
 0x11f   :  { %v499_v42 = vadd.f32 %v498_v40, %v497_v37  ;;  %v500_v43 = vpop.f32.mrb[2].mxu1  ;;  %v479_v44 = vpop.f32.mrb[3].mxu0 }
 0x120   :  { %v480_v45 = vadd.f32 %v479_v44, %v478_v41  ;;  %v501_v46 = vpop.f32.mrb[3].mxu1 }
 0x121   :  { %v397_v47 = vadd.f32 %v499_v42, %v477_v39  ;;  %v502_v48 = vadd.f32 %v501_v46, %v500_v43 }
 0x123   :  { %403 = vst [vmem:[#allocation7] sm:$0xff] %v397_v47  ;;  %v400_v49 = vadd.f32 %v502_v48, %v480_v45 }
 0x125   :  { %404 = vst [vmem:[#allocation7 + $0x8] sm:$0xff] %v400_v49 }
 0x126   :  { %605 = shalt.err (!%p602_p6)
}
 0x127   :  { %s606_s12 = scalar_lea.hbm %s684_s2, 256 }
 0x128   :  { %p607_p7 = scmp.ne.s32.totalorder %s684_s2, %s606_s12  ;;  %p610_p8 = scmp.lt.u32.totalorder %s606_s12, %s684_s2 }
 0x12a   :  { %p612_p9 = pnand %p610_p8, %p607_p7 }
 0x12c   :  { %615 = shalt.err (!%p612_p9)
}
 0x12d   :  { %s629_s17 = smov 128   ;;  %s630_s18 = smov 8  }
 0x12e   :  { %416 = dma.vmem_to_hbm [thread:$0]  %s411_s8, 256, %s684_s2, [#allocation4], %s629_s17, %s629_s17, %s630_s18  }
 0x12f   :  { %620 = dma.done.wait [#allocation4], 256  }
 0x130   :  { %621 = vsyncadd [#allocation4], 4294967040 }
 0x131   :  { %420 = vsyncpa [#allocation3], 1 }
 0x132   :  { %421 = vsyncpa [#allocation6], 1 }
 0x133   :  { %422 = vsyncpa [#allocation4], 1 }

</bundles_post_ra>
